<compile_context>
chip_gen: v5e
topology: v5e:2x2
jax: 0.10.0
libtpu: 0.0.40
codegen_flags: <defaults>
</compile_context>

<pallas_src>
import jax
import jax.numpy as jnp
from jax.experimental import pallas as pl
from jax.experimental.pallas import tpu as pltpu


def ngram_kernel(tok_ref,    # VMEM: (TB, C) int32 token ids
                 t_ref,      # VMEM: (C, V, H)  folded emb@W1 table (matmul dtype)
                 b1_ref,     # VMEM: (1, H) f32
                 w2_ref,     # VMEM: (H, V)     (matmul dtype)
                 b2_ref,     # VMEM: (1, V) f32
                 out_ref):   # VMEM: (TB, V) f32 log-probs
    tb = tok_ref.shape[0]
    ctx, vocab, hidden = t_ref.shape

    # Lane index grid used to build one-hot rows (VPU compare, no DMA).
    lane_ids = jax.lax.broadcasted_iota(jnp.int32, (tb, vocab), 1)

    # --- Embedding gather + linear1, folded into one MXU contraction per
    #     context position:  one_hot(tok_c) @ (emb_table @ W1[c]).
    h = jnp.zeros((tb, hidden), jnp.float32)
    for c in range(ctx):
        tok_c = tok_ref[:, c:c + 1]                        # (TB, 1) int32
        onehot = (lane_ids == tok_c).astype(t_ref.dtype)   # (TB, V), exact 0/1
        h = h + jnp.dot(onehot, t_ref[c],
                        preferred_element_type=jnp.float32)
    h = jnp.maximum(h + b1_ref[...], 0.0)                  # f32 epilogue (v5e-safe)

    # --- linear2 (MXU, f32 accumulation) ---
    logits = jnp.dot(h.astype(w2_ref.dtype), w2_ref[...],
                     preferred_element_type=jnp.float32) + b2_ref[...]

    # --- log_softmax along vocab (numerically stable, f32) ---
    m = jnp.max(logits, axis=-1, keepdims=True)
    shifted = logits - m
    lse = jnp.log(jnp.sum(jnp.exp(shifted), axis=-1, keepdims=True))
    out_ref[...] = shifted - lse


def ngram_forward(inputs, emb_table, w1, b1, w2, b2, *,
                  batch_tile=128, matmul_dtype=jnp.bfloat16):
    """Batched forward: inputs (B, C) int32 -> log-probs (B, V) f32."""
    vocab_size, emb_dim = emb_table.shape
    batch, context_size = inputs.shape
    hidden = w1.shape[1]
    assert w1.shape == (context_size * emb_dim, hidden)
    assert w2.shape == (hidden, vocab_size)
    assert batch_tile % 8 == 0

    # Fold embedding + linear1:  T[c] = emb_table @ W1[c]  -> (C, V, H).
    # (One-time O(V*E*H) weight transform; computed in f32, then cast.)
    w1_r = w1.reshape(context_size, emb_dim, hidden)
    t_proj = jnp.einsum("ve,ceh->cvh", emb_table, w1_r).astype(matmul_dtype)
    w2_c = w2.astype(matmul_dtype)
    b1_r = b1.reshape(1, hidden).astype(jnp.float32)
    b2_r = b2.reshape(1, vocab_size).astype(jnp.float32)

    # Clamp ids so an out-of-range token cannot silently select nothing.
    tok = jnp.clip(inputs.astype(jnp.int32), 0, vocab_size - 1)
    pad = (-batch) % batch_tile
    if pad:
        tok = jnp.concatenate(
            [tok, jnp.zeros((pad, context_size), jnp.int32)], axis=0)
    padded_batch = batch + pad
    grid = (padded_batch // batch_tile,)

    itemsize = jnp.dtype(matmul_dtype).itemsize
    cost = pl.CostEstimate(
        flops=2 * padded_batch * (context_size * vocab_size * hidden
                                  + hidden * vocab_size),
        transcendentals=padded_batch * vocab_size,
        bytes_accessed=(tok.size * 4
                        + t_proj.size * itemsize + w2_c.size * itemsize
                        + (hidden + vocab_size) * 4
                        + padded_batch * vocab_size * 4))

    out = pl.pallas_call(
        ngram_kernel,
        out_shape=jax.ShapeDtypeStruct((padded_batch, vocab_size), jnp.float32),
        grid_spec=pltpu.PrefetchScalarGridSpec(
            num_scalar_prefetch=0,
            grid=grid,
            in_specs=[
                pl.BlockSpec((batch_tile, context_size), lambda i: (i, 0)),
                pl.BlockSpec((context_size, vocab_size, hidden),
                             lambda i: (0, 0, 0)),
                pl.BlockSpec((1, hidden), lambda i: (0, 0)),
                pl.BlockSpec((hidden, vocab_size), lambda i: (0, 0)),
                pl.BlockSpec((1, vocab_size), lambda i: (0, 0)),
            ],
            out_specs=pl.BlockSpec((batch_tile, vocab_size), lambda i: (i, 0)),
        ),
        compiler_params=pltpu.CompilerParams(
            dimension_semantics=("parallel",)),
        cost_estimate=cost,
    )(tok, t_proj, b1_r, w2_c, b2_r)
    return out[:batch]


def reference_forward(inputs, emb_table, w1, b1, w2, b2):
    # Pure-JAX batched reference: row b == PyTorch module applied to inputs[b].
    embeds = emb_table[inputs].reshape(inputs.shape[0], -1)   # (B, C*E)
    h = jnp.maximum(embeds @ w1 + b1, 0.0)
    logits = h @ w2 + b2
    return jax.nn.log_softmax(logits, axis=-1)


if __name__ == "__main__":
    # nn.Module-consistent sizes; batch gives 2 grid steps of batch_tile=128.
    vocab_size = 256
    embedding_dim = 16
    context_size = 2
    hidden = 128
    batch = 256

    key = jax.random.PRNGKey(0)
    k_emb, k_w1, k_b1, k_w2, k_b2, k_idx = jax.random.split(key, 6)

    emb_table = jax.random.normal(k_emb, (vocab_size, embedding_dim), jnp.float32)
    w1 = jax.random.normal(k_w1, (context_size * embedding_dim, hidden),
                           jnp.float32) * 0.1
    b1 = jax.random.normal(k_b1, (hidden,), jnp.float32) * 0.1
    w2 = jax.random.normal(k_w2, (hidden, vocab_size), jnp.float32) * 0.1
    b2 = jax.random.normal(k_b2, (vocab_size,), jnp.float32) * 0.1

    inputs = jax.random.randint(k_idx, (batch, context_size), 0, vocab_size,
                                jnp.int32)

    ref = reference_forward(inputs, emb_table, w1, b1, w2, b2)

    # f32 MXU operands: tight check against the pure-JAX reference.
    out_f32 = jax.block_until_ready(
        ngram_forward(inputs, emb_table, w1, b1, w2, b2,
                      batch_tile=128, matmul_dtype=jnp.float32))
    assert out_f32.shape == (batch, vocab_size)
    assert jnp.allclose(out_f32, ref, atol=1e-4, rtol=1e-4), \
        "f32 mismatch vs reference"

    # bf16 MXU operands (v6e/v7x fast path), f32 accumulation + f32 epilogue.
    out_bf16 = jax.block_until_ready(
        ngram_forward(inputs, emb_table, w1, b1, w2, b2,
                      batch_tile=128, matmul_dtype=jnp.bfloat16))
    assert out_bf16.shape == (batch, vocab_size)
    assert jnp.allclose(out_bf16, ref, atol=5e-2, rtol=5e-2), \
        "bf16 mismatch vs reference"

    print("KERNEL_OK")
</pallas_src>

<mosaic_0001>
module attributes {stable_mosaic.version = 11 : i64} {
  func.func @ngram_kernel(%arg0: i32, %arg1: memref<128x2xi32, #tpu.memory_space<vmem>>, %arg2: memref<2x256x128xf32, #tpu.memory_space<vmem>>, %arg3: memref<1x128xf32, #tpu.memory_space<vmem>>, %arg4: memref<128x256xf32, #tpu.memory_space<vmem>>, %arg5: memref<1x256xf32, #tpu.memory_space<vmem>>, %arg6: memref<128x256xf32, #tpu.memory_space<vmem>>) attributes {dimension_semantics = [#tpu.dimension_semantics<parallel>], iteration_bounds = array<i64: 2>, scalar_prefetch = 0 : i64, scratch_operands = 0 : i64, tpu.core_type = #tpu.core_type<tc>, window_params = [{transform_indices = @transform_0, window_bounds = array<i64: 128, 2>}, {pipeline_mode = #tpu.pipeline_mode<synchronous>, transform_indices = @transform_1, window_bounds = array<i64: 2, 256, 128>}, {pipeline_mode = #tpu.pipeline_mode<synchronous>, transform_indices = @transform_2, window_bounds = array<i64: 1, 128>}, {pipeline_mode = #tpu.pipeline_mode<synchronous>, transform_indices = @transform_3, window_bounds = array<i64: 128, 256>}, {pipeline_mode = #tpu.pipeline_mode<synchronous>, transform_indices = @transform_4, window_bounds = array<i64: 1, 256>}, {transform_indices = @transform_5, window_bounds = array<i64: 128, 256>}]} {
    %0 = tpu.iota {dimensions = array<i32: 1>} : vector<128x256xi32>
    %cst = arith.constant 0.000000e+00 : f32
    %1 = vector.broadcast %cst : f32 to vector<128x128xf32>
    %c0 = arith.constant 0 : index
    %c0_0 = arith.constant 0 : index
    %2 = vector.load %arg1[%c0, %c0_0] : memref<128x2xi32, #tpu.memory_space<vmem>>, vector<128x1xi32>
    %3 = vector.broadcast %2 : vector<128x1xi32> to vector<128x256xi32>
    %4 = arith.cmpi eq, %0, %3 : vector<128x256xi32>
    %5 = arith.extui %4 : vector<128x256xi1> to vector<128x256xi32>
    %6 = arith.sitofp %5 : vector<128x256xi32> to vector<128x256xf32>
    %c0_1 = arith.constant 0 : index
    %c0_2 = arith.constant 0 : index
    %c0_3 = arith.constant 0 : index
    %7 = vector.load %arg2[%c0_1, %c0_2, %c0_3] : memref<2x256x128xf32, #tpu.memory_space<vmem>>, vector<1x256x128xf32>
    %8 = vector.shape_cast %7 : vector<1x256x128xf32> to vector<256x128xf32>
    %cst_4 = arith.constant dense<0.000000e+00> : vector<128x128xf32>
    %9 = tpu.matmul %6, %8, %cst_4 {dimension_numbers = #tpu.dot_dimension_numbers<[1], [0], [0], [1], [0, 0, 1, 1], [], []>} : vector<128x256xf32>, vector<256x128xf32>, vector<128x128xf32> -> vector<128x128xf32>
    %10 = arith.addf %1, %9 : vector<128x128xf32>
    %c0_5 = arith.constant 0 : index
    %c1 = arith.constant 1 : index
    %11 = vector.load %arg1[%c0_5, %c1] : memref<128x2xi32, #tpu.memory_space<vmem>>, vector<128x1xi32>
    %12 = vector.broadcast %11 : vector<128x1xi32> to vector<128x256xi32>
    %13 = arith.cmpi eq, %0, %12 : vector<128x256xi32>
    %14 = arith.extui %13 : vector<128x256xi1> to vector<128x256xi32>
    %15 = arith.sitofp %14 : vector<128x256xi32> to vector<128x256xf32>
    %c1_6 = arith.constant 1 : index
    %c0_7 = arith.constant 0 : index
    %c0_8 = arith.constant 0 : index
    %16 = vector.load %arg2[%c1_6, %c0_7, %c0_8] : memref<2x256x128xf32, #tpu.memory_space<vmem>>, vector<1x256x128xf32>
    %17 = vector.shape_cast %16 : vector<1x256x128xf32> to vector<256x128xf32>
    %cst_9 = arith.constant dense<0.000000e+00> : vector<128x128xf32>
    %18 = tpu.matmul %15, %17, %cst_9 {dimension_numbers = #tpu.dot_dimension_numbers<[1], [0], [0], [1], [0, 0, 1, 1], [], []>} : vector<128x256xf32>, vector<256x128xf32>, vector<128x128xf32> -> vector<128x128xf32>
    %19 = arith.addf %10, %18 : vector<128x128xf32>
    %c0_10 = arith.constant 0 : index
    %c0_11 = arith.constant 0 : index
    %20 = vector.load %arg3[%c0_10, %c0_11] : memref<1x128xf32, #tpu.memory_space<vmem>>, vector<1x128xf32>
    %21 = vector.broadcast %20 : vector<1x128xf32> to vector<128x128xf32>
    %22 = arith.addf %19, %21 : vector<128x128xf32>
    %cst_12 = arith.constant 0.000000e+00 : f32
    %23 = vector.broadcast %cst_12 : f32 to vector<128x128xf32>
    %24 = arith.maximumf %22, %23 : vector<128x128xf32>
    %c0_13 = arith.constant 0 : index
    %c0_14 = arith.constant 0 : index
    %25 = vector.load %arg4[%c0_13, %c0_14] : memref<128x256xf32, #tpu.memory_space<vmem>>, vector<128x256xf32>
    %cst_15 = arith.constant dense<0.000000e+00> : vector<128x256xf32>
    %26 = tpu.matmul %24, %25, %cst_15 {dimension_numbers = #tpu.dot_dimension_numbers<[1], [0], [0], [1], [0, 0, 1, 1], [], []>} : vector<128x128xf32>, vector<128x256xf32>, vector<128x256xf32> -> vector<128x256xf32>
    %c0_16 = arith.constant 0 : index
    %c0_17 = arith.constant 0 : index
    %27 = vector.load %arg5[%c0_16, %c0_17] : memref<1x256xf32, #tpu.memory_space<vmem>>, vector<1x256xf32>
    %28 = vector.broadcast %27 : vector<1x256xf32> to vector<128x256xf32>
    %29 = arith.addf %26, %28 : vector<128x256xf32>
    %cst_18 = arith.constant dense<0xFF800000> : vector<128xf32>
    %30 = vector.multi_reduction <maximumf>, %29, %cst_18 [1] : vector<128x256xf32> to vector<128xf32>
    %31 = vector.shape_cast %30 : vector<128xf32> to vector<128x1xf32>
    %32 = vector.broadcast %31 : vector<128x1xf32> to vector<128x256xf32>
    %33 = arith.subf %29, %32 : vector<128x256xf32>
    %34 = math.exp %33 : vector<128x256xf32>
    %cst_19 = arith.constant dense<0.000000e+00> : vector<128xf32>
    %35 = vector.multi_reduction <add>, %34, %cst_19 [1] : vector<128x256xf32> to vector<128xf32>
    %36 = vector.shape_cast %35 : vector<128xf32> to vector<128x1xf32>
    %37 = math.log %36 : vector<128x1xf32>
    %38 = vector.broadcast %37 : vector<128x1xf32> to vector<128x256xf32>
    %39 = arith.subf %33, %38 : vector<128x256xf32>
    %c0_20 = arith.constant 0 : index
    %c0_21 = arith.constant 0 : index
    %40 = vector.load %arg6[%c0_20, %c0_21] : memref<128x256xf32, #tpu.memory_space<vmem>>, vector<128x256xf32>
    tpu.vector_store %arg6[%c0_20, %c0_21], %39 {strides = array<i32>} : memref<128x256xf32, #tpu.memory_space<vmem>>, vector<128x256xf32>,
    return
  }
  func.func @transform_0(%arg0: i32) -> (i32, i32) {
    %c0_i32 = arith.constant 0 : i32
    %c0_i32_0 = arith.constant 0 : i32
    return %arg0, %c0_i32 : i32, i32
  }
  func.func @transform_1(%arg0: i32) -> (i32, i32, i32) {
    %c0_i32 = arith.constant 0 : i32
    %c0_i32_0 = arith.constant 0 : i32
    %c0_i32_1 = arith.constant 0 : i32
    %c0_i32_2 = arith.constant 0 : i32
    return %c0_i32, %c0_i32_0, %c0_i32_1 : i32, i32, i32
  }
  func.func @transform_2(%arg0: i32) -> (i32, i32) {
    %c0_i32 = arith.constant 0 : i32
    %c0_i32_0 = arith.constant 0 : i32
    %c0_i32_1 = arith.constant 0 : i32
    return %c0_i32, %c0_i32_0 : i32, i32
  }
  func.func @transform_3(%arg0: i32) -> (i32, i32) {
    %c0_i32 = arith.constant 0 : i32
    %c0_i32_0 = arith.constant 0 : i32
    %c0_i32_1 = arith.constant 0 : i32
    return %c0_i32, %c0_i32_0 : i32, i32
  }
  func.func @transform_4(%arg0: i32) -> (i32, i32) {
    %c0_i32 = arith.constant 0 : i32
    %c0_i32_0 = arith.constant 0 : i32
    %c0_i32_1 = arith.constant 0 : i32
    return %c0_i32, %c0_i32_0 : i32, i32
  }
  func.func @transform_5(%arg0: i32) -> (i32, i32) {
    %c0_i32 = arith.constant 0 : i32
    %c0_i32_0 = arith.constant 0 : i32
    return %arg0, %c0_i32 : i32, i32
  }
}

</mosaic_0001>

<bundles_post_ra>
// kernel: tpu_custom_call.1
= control target key start
LH: loop header
LB: loop body
LE: loop exit
PB: predicated region body
PF: predicated region fallthrough
CT: control target
= control target key end

     0   :  { %10 = vsyncpa [#allocation3], 0  ;;  %s2711_s0 = inlined_call_operand.vmem [shape: s32[256,2], index: 0, kind: input, shape index: {}]   ;;  %s2712_s1 = inlined_call_operand.hbm [shape: f32[2,256,128], index: 1, kind: input, shape index: {}]   ;;  %s2713_s2 = inlined_call_operand.vmem [shape: f32[1,128], index: 2, kind: input, shape index: {}]   ;;  %s2714_s3 = inlined_call_operand.vmem [shape: f32[128,256], index: 3, kind: input, shape index: {}]   ;;  %s2715_s4 = inlined_call_operand.vmem [shape: f32[1,256], index: 4, kind: input, shape index: {}]   ;;  %s2716_s5 = inlined_call_operand.hbm [shape: f32[256,256], index: 5, kind: output, shape index: {}]  }
   0x1   :  { %11 = vsyncpa [#allocation4], 0 }
   0x2   :  { %13 = vsyncpa [#allocation4 + $0x1], 0  ;;  %s1942_s18 = smov 0   ;;  %s1944_s19 = smov 0  }
   0x3   :  { %s1946_s20 = smov 0   ;;  %s1948_s21 = smov 0  }
   0x4 LB: > { %s1963_s22 = sadd.s32 4294967295, %s1902_s21   ;;  %s1458_s23 = sadd.s32 4294967294, %s1902_s21   ;;  %s1902_s21 = sphi %s1948_s21, %s2722_s21   ;;  %s1898_s20 = sphi %s1946_s20, %s2721_s20   ;;  %s1894_s19 = sphi %s1944_s19, %s2720_s19   ;;  %s1890_s18 = sphi %s1942_s18, %s2719_s18  }
   0x5   : > { %s1967_s24 = sadd.s32 1, %s1902_s21   ;;  %s136_s25 = sadd.s32 1, %s1898_s20 }
   0x6   : > { %s133_s26 = ssub.s32 %s1902_s21, %s1967_s24  ;;  %p146_p0 = scmp.ne.s32.totalorder %s1898_s20, %s1894_s19 }
   0x7   : > { %p134_p1 = scmp.eq.s32.totalorder %s133_s26, 0  ;;  %p147_p2 = scmp.eq.s32.totalorder %s1963_s22, 1 }
   0x8   : > { %p152_p3 = scmp.ne.s32.totalorder %s1894_s19, %s1890_s18  ;;  %p153_p4 = scmp.eq.s32.totalorder %s1458_s23, 1 }
   0x9   : > { %s1978_s27 = scalar_select %p134_p1, %s1898_s20, %s136_s25  }
   0xa   : > { %p1980_p5 = por %p147_p2, %p146_p0  ;;  %p1984_p6 = por %p153_p4, %p152_p3 }
   0xb   : > { %p1459_p7 = scmp.ge.s32.totalorder %s1902_s21, 1  ;;  %p160_p8 = scmp.lt.s32.totalorder %s1902_s21, 3 }
   0xc   : > { %p1649_p9 = scmp.eq.s32.totalorder %s1963_s22, 0  ;;  %s171_s7 = sshll.u32 %s2712_s1, 4  ;;  %s172_s7 = int_to_ptr.hbm [resolvable:$true] %s171_s7 }
   0xd   : > { %p161_p10 = pnand %p1459_p7, %p160_p8  ;;  %s1904_s8 = smov [#allocation2]  }
   0xe   : > { %s173_s9 = sshll.u32 %s1904_s8, 4  ;;  %s1905_s10 = smov 128   ;;  %s174_s9 = int_to_ptr.vmem [resolvable:$true] %s173_s9 }
   0xf   : > { %p1641_p11 = pneg %p161_p10  ;;  %s1906_s11 = smov 8  }
  0x10   : > { %207 = sbr.rel (%p161_p10) target bundleno = 861 (0x35d), region = 40 }
  0x11   : > { %p1642_p12 = pnand %p1649_p9, %p1641_p11 }
  0x13   : > { %1644 = dma.hbm_to_vmem [thread:$0]  (!%p1642_p12), %s172_s7, 8192, %s174_s9, [#allocation3], %s1905_s10, %s1905_s10, %s1906_s11  }
  0x15   : > { %1881 = dma.done.wait (%p1649_p9), [#allocation3], 8192  }
  0x16   : > { %1883 = vsyncadd (%p1649_p9), [#allocation3], 4294959104  ;;  %s1465_s12 = sshll.u32 %s1963_s22, 4  ;;  %v1907_v0 = vmov 1   ;;  %v598_v7 = vld [vmem:[#allocation2 + $0x178] sm:$0xff]  ;;  %v597_v9 = vld [vmem:[#allocation2 + $0x170] sm:$0xff]  ;;  %v243_v62 = vlaneseq }
  0x17   : > { %1693 = vset.pattern.permute.xlu1 %v1907_v0  ;;  %1692 = vset.pattern.permute.xlu0 %v1907_v0  ;;  %p237_p13 = scmp.lt.s32.totalorder %s1465_s12, 31  ;;  %v614_v8 = vld [vmem:[#allocation2 + $0x1f8] sm:$0xff]  ;;  %v613_v10 = vld [vmem:[#allocation2 + $0x1f0] sm:$0xff]  ;;  %v596_v11 = vld [vmem:[#allocation2 + $0x168] sm:$0xff]  ;;  %v1908_v20 = vmov 0   ;;  %s233_s30 = sand.u32 1, %s1894_s19  }
  0x18   : > { %1694 = vset.pattern.permute.xlu2 %v1907_v0  ;;  %1603 = vmatpush.msra.mxu2 %v598_v7  ;;  %v612_v12 = vld [vmem:[#allocation2 + $0x1e8] sm:$0xff]  ;;  %v595_v15 = vld [vmem:[#allocation2 + $0x160] sm:$0xff]  ;;  %v594_v17 = vld [vmem:[#allocation2 + $0x158] sm:$0xff]  ;;  %v2071_v63 = vand.u32 127, %v243_v62  ;;  %s1464_s6 = sshll.u32 %s233_s30, 8  ;;  %s1602_s8 = sshll.u32 %s1963_s22, 8 }
  0x19   : > { %s2724_s12 = smov (!%p237_p13, %s1465_s12), 31  ;;  %1619 = vmatpush.msra.mxu3 %v614_v8  ;;  %615 = vmatpush.msra.mxu0 %v598_v7  ;;  %v611_v16 = vld [vmem:[#allocation2 + $0x1e0] sm:$0xff]  ;;  %v610_v18 = vld [vmem:[#allocation2 + $0x1d8] sm:$0xff]  ;;  %v593_v21 = vld [vmem:[#allocation2 + $0x150] sm:$0xff]  ;;  %s2613_s7 = scalar_lea.vmem [#allocation5], %s1464_s6 }
  0x1a   : > { %s1466_s13 = sshll.u32 %s2724_s12, 3  ;;  %680 = vmatpush.msra.mxu1 %v614_v8  ;;  %1604 = vmatpush.msra.mxu2 %v597_v9  ;;  %v609_v22 = vld [vmem:[#allocation2 + $0x1d0] sm:$0xff]  ;;  %v592_v23 = vld [vmem:[#allocation2 + $0x148] sm:$0xff]  ;;  %v591_v26 = vld [vmem:[#allocation2 + $0x140] sm:$0xff]  ;;  %s1380_s11 = scalar_lea.hbm %s2716_s5, %s1602_s8 }
  0x1b   : > { %s2007_s16 = scalar_lea.vmem %s2711_s0, %s1466_s13  ;;  %1620 = vmatpush.msra.mxu3 %v613_v10  ;;  %616 = vmatpush.msra.mxu0 %v597_v9  ;;  %v608_v25 = vld [vmem:[#allocation2 + $0x1c8] sm:$0xff]  ;;  %v607_v27 = vld [vmem:[#allocation2 + $0x1c0] sm:$0xff]  ;;  %v590_v28 = vld [vmem:[#allocation2 + $0x138] sm:$0xff]  ;;  %s1381_s12 = sshll.u32 %s2613_s7, 4  ;;  %s1382_s12 = int_to_ptr.vmem [resolvable:$true] %s1381_s12 }
  0x1c   : > { %v2010_v1 = vld [vmem:[%s2007_s16 + $0x50] sm:$0xff]  ;;  %v2013_v2 = vld [vmem:[%s2007_s16 + $0x40] sm:$0xff]  ;;  %v2022_v4 = vld [vmem:[%s2007_s16 + $0x58] sm:$0xff]  ;;  %681 = vmatpush.msra.mxu1 %v613_v10  ;;  %1605 = vmatpush.msra.mxu2 %v596_v11  ;;  %s1383_s13 = sshll.u32 %s1380_s11, 4  ;;  %s1368_s22 = scalar_lea.sflag [#allocation4], %s233_s30  ;;  %s1384_s13 = int_to_ptr.hbm [resolvable:$true] %s1383_s13 }
  0x1d   : > { %469 = vperm.xlu1 %1693, %v2010_v1   ;;  %463 = vperm.xlu0 %1692, %v2013_v2   ;;  %v2018_v3 = vld [vmem:[%s2007_s16 + $0x60] sm:$0xff]  ;;  %v2025_v5 = vld [vmem:[%s2007_s16 + $0x48] sm:$0xff]  ;;  %v2034_v13 = vld [vmem:[%s2007_s16 + $0x78] sm:$0xff]  ;;  %s1850_s14 = sshra.s32 %s1384_s13, 4  ;;  %s1856_s23 = scalar_lea.hbm %s2716_s5, 512  ;;  %s1851_s14 = int_to_ptr.hbm [resolvable:$true] %s1850_s14 }
  0x1e   : > { %475 = vperm.xlu2 %1694, %v2018_v3   ;;  %v2028_v6 = vld [vmem:[%s2007_s16 + $0x68] sm:$0xff]  ;;  %v2037_v14 = vld [vmem:[%s2007_s16 + $0x70] sm:$0xff]  ;;  %1621 = vmatpush.msra.mxu3 %v612_v12  ;;  %v246_v19 = vld [vmem:[%s2007_s16] sm:$0xff]  ;;  %s1852_s15 = scalar_lea.hbm %s1851_s14, 256  ;;  %p1857_p3 = scmp.lt.s32.totalorder %s1851_s14, %s2716_s5 }
  0x1f   : > { %1606 = vmatpush.msra.mxu2 %v595_v15  ;;  %617 = vmatpush.msra.mxu0 %v596_v11  ;;  %v247_v24 = vld [vmem:[%s2007_s16 + $0x8] sm:$0xff]  ;;  %v606_v29 = vld [vmem:[#allocation2 + $0x1b8] sm:$0xff]  ;;  %v589_v30 = vld [vmem:[#allocation2 + $0x130] sm:$0xff]  ;;  %p1853_p0 = scmp.ne.s32.totalorder %s1851_s14, %s1852_s15  ;;  %p1858_p4 = scmp.lt.s32.totalorder %s1856_s23, %s1852_s15 }
  0x20   : > { %1622 = vmatpush.msra.mxu3 %v611_v16  ;;  %682 = vmatpush.msra.mxu1 %v612_v12  ;;  %v605_v31 = vld [vmem:[#allocation2 + $0x1b0] sm:$0xff]  ;;  %v588_v32 = vld [vmem:[#allocation2 + $0x128] sm:$0xff]  ;;  %v587_v35 = vld [vmem:[#allocation2 + $0x120] sm:$0xff] }
  0x21   : > { %1607 = vmatpush.msra.mxu2 %v594_v17  ;;  %618 = vmatpush.msra.mxu0 %v595_v15  ;;  %v248_v33 = vld [vmem:[%s2007_s16 + $0x10] sm:$0xff]  ;;  %v604_v34 = vld [vmem:[#allocation2 + $0x1a8] sm:$0xff]  ;;  %v603_v36 = vld [vmem:[#allocation2 + $0x1a0] sm:$0xff]  ;;  %p1854_p1 = pnand %p1853_p0, %p1980_p5  ;;  %p1859_p7 = por %p1858_p4, %p1857_p3 }
  0x22   : > { %1623 = vmatpush.msra.mxu3 %v610_v18  ;;  %683 = vmatpush.msra.mxu1 %v611_v16  ;;  %v586_v37 = vld [vmem:[#allocation2 + $0x118] sm:$0xff]  ;;  %v585_v40 = vld [vmem:[#allocation2 + $0x110] sm:$0xff]  ;;  %v584_v42 = vld [vmem:[#allocation2 + $0x108] sm:$0xff] }
  0x23   : > { %1608 = vmatpush.msra.mxu2 %v593_v21  ;;  %619 = vmatpush.msra.mxu0 %v594_v17  ;;  %v602_v38 = vld [vmem:[#allocation2 + $0x198] sm:$0xff]  ;;  %v601_v41 = vld [vmem:[#allocation2 + $0x190] sm:$0xff]  ;;  %v250_v43 = vld [vmem:[%s2007_s16 + $0x20] sm:$0xff]  ;;  %p1855_p2 = pneg %p1854_p1 }
  0x24   : > { %1624 = vmatpush.msra.mxu3 %v609_v22  ;;  %684 = vmatpush.msra.mxu1 %v610_v18  ;;  %v249_v39 = vld [vmem:[%s2007_s16 + $0x18] sm:$0xff]  ;;  %v600_v44 = vld [vmem:[#allocation2 + $0x188] sm:$0xff]  ;;  %v252_v47 = vld [vmem:[%s2007_s16 + $0x30] sm:$0xff] }
  0x25   : > { %472 = vperm.xlu1 %1693, %v2022_v4   ;;  %466 = vperm.xlu0 %1692, %v2025_v5   ;;  %v251_v45 = vld [vmem:[%s2007_s16 + $0x28] sm:$0xff]  ;;  %v253_v46 = vld [vmem:[%s2007_s16 + $0x38] sm:$0xff]  ;;  %v583_v48 = vld [vmem:[#allocation2 + $0x100] sm:$0xff]  ;;  %p1860_p8 = pnand %p1859_p7, %p1855_p2 }
  0x26   : > { %478 = vperm.xlu2 %1694, %v2028_v6   ;;  %1609 = vmatpush.msra.mxu2 %v592_v23  ;;  %v599_v49 = vld [vmem:[#allocation2 + $0x180] sm:$0xff]  ;;  %v421_v50 = vld [vmem:[#allocation2 + $0x78] sm:$0xff]  ;;  %v420_v52 = vld [vmem:[#allocation2 + $0x70] sm:$0xff] }
  0x27   : > { %1625 = vmatpush.msra.mxu3 %v608_v25  ;;  %620 = vmatpush.msra.mxu0 %v593_v21  ;;  %v437_v51 = vld [vmem:[#allocation2 + $0xf8] sm:$0xff]  ;;  %v436_v53 = vld [vmem:[#allocation2 + $0xf0] sm:$0xff]  ;;  %v419_v54 = vld [vmem:[#allocation2 + $0x68] sm:$0xff] }
  0x28   : > { %1610 = vmatpush.msra.mxu2 %v591_v26  ;;  %685 = vmatpush.msra.mxu1 %v609_v22  ;;  %v435_v55 = vld [vmem:[#allocation2 + $0xe8] sm:$0xff]  ;;  %v418_v56 = vld [vmem:[#allocation2 + $0x60] sm:$0xff]  ;;  %v417_v58 = vld [vmem:[#allocation2 + $0x58] sm:$0xff] }
  0x29   : > { %1626 = vmatpush.msra.mxu3 %v607_v27  ;;  %621 = vmatpush.msra.mxu0 %v592_v23  ;;  %v434_v57 = vld [vmem:[#allocation2 + $0xe0] sm:$0xff]  ;;  %v433_v59 = vld [vmem:[#allocation2 + $0xd8] sm:$0xff]  ;;  %v416_v60 = vld [vmem:[#allocation2 + $0x50] sm:$0xff] }
  0x2a   : > { %1611 = vmatpush.msra.mxu2 %v590_v28  ;;  %686 = vmatpush.msra.mxu1 %v608_v25  ;;  %v432_v61 = vld [vmem:[#allocation2 + $0xd0] sm:$0xff]  ;;  %v413_v7 = vld [vmem:[#allocation2 + $0x38] sm:$0xff]  ;;  %v427_v15 = vld [vmem:[#allocation2 + $0xa8] sm:$0xff] }
  0x2b   : > { %1627 = vmatpush.msra.mxu3 %v606_v29  ;;  %622 = vmatpush.msra.mxu0 %v591_v26  ;;  %v429_v8 = vld [vmem:[#allocation2 + $0xb8] sm:$0xff]  ;;  %v412_v9 = vld [vmem:[#allocation2 + $0x30] sm:$0xff]  ;;  %v410_v16 = vld [vmem:[#allocation2 + $0x20] sm:$0xff] }
  0x2c   : > { %1612 = vmatpush.msra.mxu2 %v589_v30  ;;  %687 = vmatpush.msra.mxu1 %v607_v27  ;;  %v428_v10 = vld [vmem:[#allocation2 + $0xb0] sm:$0xff]  ;;  %v426_v17 = vld [vmem:[#allocation2 + $0xa0] sm:$0xff]  ;;  %v409_v21 = vld [vmem:[#allocation2 + $0x18] sm:$0xff] }
  0x2d   : > { %484 = vperm.xlu1 %1693, %v2034_v13   ;;  %481 = vperm.xlu0 %1692, %v2037_v14   ;;  %v425_v22 = vld [vmem:[#allocation2 + $0x98] sm:$0xff]  ;;  %v408_v23 = vld [vmem:[#allocation2 + $0x10] sm:$0xff]  ;;  %v407_v27 = vld [vmem:[#allocation2 + $0x8] sm:$0xff] }
  0x2e   : > { %1695 = vset.pattern.permute.xlu2 %v1908_v20  ;;  %1628 = vmatpush.msra.mxu3 %v605_v31 }
  0x2f   : > { %263 = vperm.xlu2 %1695, %v246_v19   ;;  %1613 = vmatpush.msra.mxu2 %v588_v32 }
  0x30   : > { %1629 = vmatpush.msra.mxu3 %v604_v34  ;;  %623 = vmatpush.msra.mxu0 %v590_v28  ;;  %v423_v28 = vld [vmem:[#allocation2 + $0x88] sm:$0xff] }
  0x31   : > { %1614 = vmatpush.msra.mxu2 %v587_v35  ;;  %688 = vmatpush.msra.mxu1 %v606_v29 }
  0x32   : > { %1630 = vmatpush.msra.mxu3 %v603_v36  ;;  %624 = vmatpush.msra.mxu0 %v589_v30  ;;  %v406_v30 = vld [vmem:[#allocation2] sm:$0xff] }
  0x33   : > { %1615 = vmatpush.msra.mxu2 %v586_v37  ;;  %689 = vmatpush.msra.mxu1 %v605_v31  ;;  %v422_v31 = vld [vmem:[#allocation2 + $0x80] sm:$0xff] }
  0x34   : > { %1631 = vmatpush.msra.mxu3 %v602_v38  ;;  %625 = vmatpush.msra.mxu0 %v588_v32 }
  0x35   : > { %439 = vperm.xlu0 %1692, %v246_v19   ;;  %1696 = vset.pattern.permute.xlu1 %v1908_v20 }
  0x36   : > { %266 = vperm.xlu1 %1696, %v247_v24   ;;  %1616 = vmatpush.msra.mxu2 %v585_v40 }
  0x37   : > { %1697 = vset.pattern.permute.xlu2 %v1907_v0  ;;  %1632 = vmatpush.msra.mxu3 %v601_v41 }
  0x38   : > { %442 = vperm.xlu2 %1697, %v247_v24   ;;  %1617 = vmatpush.msra.mxu2 %v584_v42  ;;  %v424_v24 = vld [vmem:[#allocation2 + $0x90] sm:$0xff] }
  0x39   : > { %1633 = vmatpush.msra.mxu3 %v600_v44  ;;  %690 = vmatpush.msra.mxu1 %v604_v34 }
  0x3a   : > { %626 = vmatpush.msra.mxu0 %v587_v35  ;;  %1618 = vmatpush.msra.mxu2 %v583_v48 }
  0x3b   : > { %691 = vmatpush.msra.mxu1 %v603_v36  ;;  %1634 = vmatpush.msra.mxu3 %v599_v49 }
  0x3c   : > { %627 = vmatpush.msra.mxu0 %v586_v37  ;;  %745 = vmatpush.msrb.mxu2 %v421_v50  ;;  %v937_v50 = vld [vmem:[%s2714_s3 + $0xd0] sm:$0xff] }
  0x3d   : > { %1698 = vset.pattern.permute.xlu0 %v1908_v20  ;;  %692 = vmatpush.msra.mxu1 %v602_v38 }
  0x3e   : > { %1699 = vset.pattern.permute.xlu1 %v1907_v0  ;;  %269 = vperm.xlu0 %1698, %v248_v33  }
  0x3f   : > { %445 = vperm.xlu1 %1699, %v248_v33   ;;  %628 = vmatpush.msra.mxu0 %v585_v40 }
  0x40   : > { %1700 = vset.pattern.permute.xlu2 %v1908_v20  ;;  %693 = vmatpush.msra.mxu1 %v601_v41 }
  0x41   : > { %272 = vperm.xlu2 %1700, %v249_v39   ;;  %629 = vmatpush.msra.mxu0 %v584_v42 }
  0x42   : > { %694 = vmatpush.msra.mxu1 %v600_v44  ;;  %810 = vmatpush.msrb.mxu3 %v437_v51  ;;  %v938_v51 = vld [vmem:[%s2714_s3 + $0xd8] sm:$0xff] }
  0x43   : > { %630 = vmatpush.msra.mxu0 %v583_v48  ;;  %746 = vmatpush.msrb.mxu2 %v420_v52  ;;  %v940_v48 = vld [vmem:[%s2714_s3 + $0xe8] sm:$0xff]  ;;  %v935_v52 = vld [vmem:[%s2714_s3 + $0xc0] sm:$0xff] }
  0x44   : > { %695 = vmatpush.msra.mxu1 %v599_v49  ;;  %811 = vmatpush.msrb.mxu3 %v436_v53  ;;  %v936_v53 = vld [vmem:[%s2714_s3 + $0xc8] sm:$0xff] }
  0x45   : > { %747 = vmatpush.msrb.mxu2 %v419_v54 }
  0x46   : > { %1701 = vset.pattern.permute.xlu0 %v1907_v0  ;;  %812 = vmatpush.msrb.mxu3 %v435_v55  ;;  %v933_v55 = vld [vmem:[%s2714_s3 + $0xb0] sm:$0xff] }
  0x47   : > { %448 = vperm.xlu1 %1699, %v249_v39   ;;  %451 = vperm.xlu0 %1701, %v250_v43  }
  0x48   : > { %748 = vmatpush.msrb.mxu2 %v418_v56  ;;  %813 = vmatpush.msrb.mxu3 %v434_v57  ;;  %v934_v56 = vld [vmem:[%s2714_s3 + $0xb8] sm:$0xff]  ;;  %v931_v57 = vld [vmem:[%s2714_s3 + $0xa0] sm:$0xff] }
  0x49   : > { %275 = vperm.xlu2 %1700, %v250_v43  }
  0x4a   : > { %749 = vmatpush.msrb.mxu2 %v417_v58  ;;  %814 = vmatpush.msrb.mxu3 %v433_v59  ;;  %v932_v58 = vld [vmem:[%s2714_s3 + $0xa8] sm:$0xff] }
  0x4c   : > { %750 = vmatpush.msrb.mxu2 %v416_v60  ;;  %815 = vmatpush.msrb.mxu3 %v432_v61 }
  0x4f   : > { %1702 = vset.pattern.permute.xlu1 %v1908_v20  ;;  %1704 = vset.pattern.permute.xlu0 %v1908_v20 }
  0x50   : > { %278 = vperm.xlu1 %1702, %v251_v45   ;;  %284 = vperm.xlu0 %1704, %v253_v46  }
  0x51   : > { %1703 = vset.pattern.permute.xlu2 %v1907_v0 }
  0x52   : > { %454 = vperm.xlu2 %1703, %v251_v45   ;;  %v941_v45 = vld [vmem:[%s2714_s3 + $0xf0] sm:$0xff] }
  0x53   : > { %949 = vmatpush.msrb.mxu0 %v941_v45 }
  0x58   : > { %281 = vperm.xlu1 %1702, %v252_v47   ;;  %296 = vperm.xlu0 %1704, %v2022_v4   ;;  %v2074_v4 = vadd.s32 128, %v2071_v63 }
  0x5a   : > { %457 = vperm.xlu2 %1703, %v252_v47   ;;  %v939_v47 = vld [vmem:[%s2714_s3 + $0xe0] sm:$0xff] }
  0x5b   : > { %950 = vmatpush.msrb.mxu0 %v939_v47 }
  0x5d   : > { %951 = vmatpush.msrb.mxu0 %v937_v50 }
  0x5f   : > { %952 = vmatpush.msrb.mxu0 %v935_v52 }
  0x60   : > { %1705 = vset.pattern.permute.xlu1 %v1907_v0  ;;  %305 = vperm.xlu0 %1704, %v2037_v14   ;;  %v411_v14 = vld [vmem:[#allocation2 + $0x28] sm:$0xff] }
  0x61   : > { %460 = vperm.xlu1 %1705, %v253_v46   ;;  %v942_v46 = vld [vmem:[%s2714_s3 + $0xf8] sm:$0xff]  ;;  %953 = vmatpush.msrb.mxu0 %v933_v55 }
  0x62   : > { %1706 = vset.pattern.permute.xlu2 %v1908_v20  ;;  %1014 = vmatpush.msrb.mxu1 %v942_v46 }
  0x63   : > { %287 = vperm.xlu2 %1706, %v2013_v2   ;;  %v414_v2 = vld [vmem:[#allocation2 + $0x40] sm:$0xff]  ;;  %954 = vmatpush.msrb.mxu0 %v931_v57 }
  0x64   : > { %1015 = vmatpush.msrb.mxu1 %v940_v48 }
  0x66   : > { %1016 = vmatpush.msrb.mxu1 %v938_v51 }
  0x68   : > { %1708 = vset.pattern.permute.xlu0 %v1907_v0  ;;  %v415_v0 = vld [vmem:[#allocation2 + $0x48] sm:$0xff]  ;;  %1017 = vmatpush.msrb.mxu1 %v936_v53 }
  0x69   : > { %1707 = vset.pattern.permute.xlu1 %v1908_v20  ;;  %751 = vmatpush.msrb.mxu2 %v415_v0  ;;  %v929_v0 = vld [vmem:[%s2714_s3 + $0x90] sm:$0xff] }
  0x6a   : > { %290 = vperm.xlu1 %1707, %v2025_v5   ;;  %1018 = vmatpush.msrb.mxu1 %v934_v56 }
  0x6b   : > { %293 = vperm.xlu2 %1706, %v2010_v1   ;;  %v431_v1 = vld [vmem:[#allocation2 + $0xc8] sm:$0xff]  ;;  %752 = vmatpush.msrb.mxu2 %v414_v2  ;;  %v927_v2 = vld [vmem:[%s2714_s3 + $0x80] sm:$0xff] }
  0x6c   : > { %816 = vmatpush.msrb.mxu3 %v431_v1  ;;  %1019 = vmatpush.msrb.mxu1 %v932_v58  ;;  %v930_v1 = vld [vmem:[%s2714_s3 + $0x98] sm:$0xff] }
  0x6d   : > { %753 = vmatpush.msrb.mxu2 %v413_v7  ;;  %955 = vmatpush.msrb.mxu0 %v929_v0 }
  0x6e   : > { %1020 = vmatpush.msrb.mxu1 %v930_v1 }
  0x6f   : > { %754 = vmatpush.msrb.mxu2 %v412_v9  ;;  %956 = vmatpush.msrb.mxu0 %v927_v2  ;;  %v925_v9 = vld [vmem:[%s2714_s3 + $0x70] sm:$0xff] }
  0x71   : > { %755 = vmatpush.msrb.mxu2 %v411_v14  ;;  %957 = vmatpush.msrb.mxu0 %v925_v9 }
  0x72   : > { %299 = vperm.xlu1 %1707, %v2018_v3   ;;  %v430_v3 = vld [vmem:[#allocation2 + $0xc0] sm:$0xff] }
  0x73   : > { %302 = vperm.xlu2 %1706, %v2028_v6   ;;  %817 = vmatpush.msrb.mxu3 %v430_v3  ;;  %v1909_v6 = vmov 1.0   ;;  %v928_v3 = vld [vmem:[%s2714_s3 + $0x88] sm:$0xff] }
  0x74   : > { %756 = vmatpush.msrb.mxu2 %v410_v16  ;;  %1021 = vmatpush.msrb.mxu1 %v928_v3 }
  0x75   : > { %818 = vmatpush.msrb.mxu3 %v429_v8 }
  0x76   : > { %757 = vmatpush.msrb.mxu2 %v409_v21  ;;  %v920_v21 = vld [vmem:[%s2714_s3 + $0x48] sm:$0xff] }
  0x77   : > { %819 = vmatpush.msrb.mxu3 %v428_v10  ;;  %v926_v10 = vld [vmem:[%s2714_s3 + $0x78] sm:$0xff] }
  0x78   : > { %758 = vmatpush.msrb.mxu2 %v408_v23  ;;  %1022 = vmatpush.msrb.mxu1 %v926_v10 }
  0x79   : > { %820 = vmatpush.msrb.mxu3 %v427_v15 }
  0x7a   : > { %308 = vperm.xlu1 %1707, %v2034_v13   ;;  %v476_v13 = vpop.permute.xlu2 %475  ;;  %759 = vmatpush.msrb.mxu2 %v407_v27  ;;  %v915_v27 = vld [vmem:[%s2714_s3 + $0x20] sm:$0xff] }
  0x7b   : > { %821 = vmatpush.msrb.mxu3 %v426_v17  ;;  %vm510_vm10 = vcmp.eq.s32.totalorder %v2071_v63, %v476_v13  ;;  %vm511_vm11 = vcmp.eq.s32.totalorder %v2074_v4, %v476_v13  ;;  %v924_v13 = vld [vmem:[%s2714_s3 + $0x68] sm:$0xff]  ;;  %v921_v17 = vld [vmem:[%s2714_s3 + $0x50] sm:$0xff] }
  0x7c   : > { %760 = vmatpush.msrb.mxu2 %v406_v30  ;;  %1023 = vmatpush.msrb.mxu1 %v924_v13 }
  0x7d   : > { %822 = vmatpush.msrb.mxu3 %v425_v22 }
  0x7f   : > { %823 = vmatpush.msrb.mxu3 %v424_v24 }
  0x81   : > { %824 = vmatpush.msrb.mxu3 %v423_v28 }
  0x82   : > { %v479_v20 = vpop.permute.xlu2 %478 }
  0x83   : > { %825 = vmatpush.msrb.mxu3 %v422_v31  ;;  %vm512_vm14 = vcmp.eq.s32.totalorder %v2071_v63, %v479_v20  ;;  %vm513_vm15 = vcmp.eq.s32.totalorder %v2074_v4, %v479_v20  ;;  %v919_v20 = vld [vmem:[%s2714_s3 + $0x40] sm:$0xff] }
  0x8a   : > { %v264_v29 = vpop.permute.xlu2 %263 }
  0x8f   : > { %v464_v5 = vpop.permute.xlu0 %463  ;;  %v470_v11 = vpop.permute.xlu1 %469 }
  0x90   : > { %vm502_vm0 = vcmp.eq.s32.totalorder %v2071_v63, %v464_v5  ;;  %vm503_vm1 = vcmp.eq.s32.totalorder %v2074_v4, %v464_v5  ;;  %vm506_vm4 = vcmp.eq.s32.totalorder %v2071_v63, %v470_v11  ;;  %vm507_vm5 = vcmp.eq.s32.totalorder %v2074_v4, %v470_v11 }
  0x91   : > { %1539 = vmatmul.msk.f32.vlgmr.msra.gmra.mxu2 %vm502_vm0, %v1909_v6  ;;  %1555 = vmatmul.msk.f32.vlgmr.msra.gmra.mxu3 %vm503_vm1, %v1909_v6 }
  0x92   : > { %v443_v33 = vpop.permute.xlu2 %442 }
  0x93   : > { %vm488_vm12 = vcmp.eq.s32.totalorder %v2071_v63, %v443_v33  ;;  %vm489_vm13 = vcmp.eq.s32.totalorder %v2074_v4, %v443_v33 }
  0x97   : > { %v467_v12 = vpop.permute.xlu0 %466  ;;  %v473_v19 = vpop.permute.xlu1 %472 }
  0x98   : > { %vm504_vm2 = vcmp.eq.s32.totalorder %v2071_v63, %v467_v12  ;;  %vm505_vm3 = vcmp.eq.s32.totalorder %v2074_v4, %v467_v12  ;;  %vm508_vm7 = vcmp.eq.s32.totalorder %v2071_v63, %v473_v19  ;;  %vm509_vm9 = vcmp.eq.s32.totalorder %v2074_v4, %v473_v19  ;;  %v923_v12 = vld [vmem:[%s2714_s3 + $0x60] sm:$0xff] }
  0x99   : > { %1540 = vmatmul.msk.f32.gmra.mxu2 %vm504_vm2, %v1909_v6  ;;  %1556 = vmatmul.msk.f32.gmra.mxu3 %vm505_vm3, %v1909_v6 }
  0x9a   : > { %958 = vmatpush.msrb.mxu0 %v923_v12 }
  0x9b   : > { %v273_v35 = vpop.permute.xlu2 %272 }
  0x9c   : > { %959 = vmatpush.msrb.mxu0 %v921_v17 }
  0x9e   : > { %960 = vmatpush.msrb.mxu0 %v919_v20 }
  0x9f   : > { %v482_v18 = vpop.permute.xlu0 %481  ;;  %v485_v26 = vpop.permute.xlu1 %484 }
  0xa0   : > { %vm514_vm2 = vcmp.eq.s32.totalorder %v2071_v63, %v482_v18  ;;  %vm515_vm3 = vcmp.eq.s32.totalorder %v2074_v4, %v482_v18  ;;  %v922_v18 = vld [vmem:[%s2714_s3 + $0x58] sm:$0xff] }
  0xa1   : > { %1541 = vmatmul.msk.f32.gmra.mxu2 %vm506_vm4, %v1909_v6  ;;  %1557 = vmatmul.msk.f32.gmra.mxu3 %vm507_vm5, %v1909_v6 }
  0xa2   : > { %1024 = vmatpush.msrb.mxu1 %v922_v18 }
  0xa3   : > { %v276_v38 = vpop.permute.xlu2 %275 }
  0xa4   : > { %1025 = vmatpush.msrb.mxu1 %v920_v21 }
  0xa7   : > { %v440_v25 = vpop.permute.xlu0 %439 }
  0xa8   : > { %vm486_vm6 = vcmp.eq.s32.totalorder %v2071_v63, %v440_v25  ;;  %vm487_vm8 = vcmp.eq.s32.totalorder %v2074_v4, %v440_v25  ;;  %v267_v32 = vpop.permute.xlu1 %266  ;;  %v917_v25 = vld [vmem:[%s2714_s3 + $0x30] sm:$0xff] }
  0xa9   : > { %1531 = vmatmul.msk.f32.vlgmr.msra.gmra.mxu0 %vm486_vm6, %v1909_v6  ;;  %1542 = vmatmul.msk.f32.gmra.mxu2 %vm508_vm7, %v1909_v6  ;;  %vm516_vm6 = vcmp.eq.s32.totalorder %v2071_v63, %v485_v26  ;;  %vm517_vm7 = vcmp.eq.s32.totalorder %v2074_v4, %v485_v26  ;;  %v918_v26 = vld [vmem:[%s2714_s3 + $0x38] sm:$0xff] }
  0xaa   : > { %1547 = vmatmul.msk.f32.vlgmr.msra.gmra.mxu1 %vm487_vm8, %v1909_v6  ;;  %1558 = vmatmul.msk.f32.gmra.mxu3 %vm509_vm9, %v1909_v6 }
  0xab   : > { %961 = vmatpush.msrb.mxu0 %v917_v25  ;;  %1026 = vmatpush.msrb.mxu1 %v918_v26 }
  0xac   : > { %v455_v40 = vpop.permute.xlu2 %454 }
  0xad   : > { %962 = vmatpush.msrb.mxu0 %v915_v27 }
  0xb0   : > { %v270_v36 = vpop.permute.xlu0 %269 }
  0xb1   : > { %1543 = vmatmul.msk.f32.gmra.mxu2 %vm510_vm10, %v1909_v6  ;;  %1532 = vmatmul.msk.f32.gmra.mxu0 %vm488_vm12, %v1909_v6  ;;  %v446_v34 = vpop.permute.xlu1 %445  ;;  %vm310_vm10 = vcmp.eq.s32.totalorder %v2071_v63, %v264_v29  ;;  %vm496_vm12 = vcmp.eq.s32.totalorder %v2071_v63, %v455_v40 }
  0xb2   : > { %1559 = vmatmul.msk.f32.gmra.mxu3 %vm511_vm11, %v1909_v6  ;;  %1548 = vmatmul.msk.f32.gmra.mxu1 %vm489_vm13, %v1909_v6  ;;  %vm490_vm0 = vcmp.eq.s32.totalorder %v2071_v63, %v446_v34  ;;  %vm491_vm1 = vcmp.eq.s32.totalorder %v2074_v4, %v446_v34  ;;  %vm311_vm11 = vcmp.eq.s32.totalorder %v2074_v4, %v264_v29  ;;  %v916_v29 = vld [vmem:[%s2714_s3 + $0x28] sm:$0xff]  ;;  %v913_v34 = vld [vmem:[%s2714_s3 + $0x10] sm:$0xff] }
  0xb3   : > { %vm497_vm13 = vcmp.eq.s32.totalorder %v2074_v4, %v455_v40  ;;  %1027 = vmatpush.msrb.mxu1 %v916_v29  ;;  %963 = vmatpush.msrb.mxu0 %v913_v34 }
  0xb4   : > { %v458_v42 = vpop.permute.xlu2 %457 }
  0xb9   : > { %1544 = vmatmul.msk.f32.gmra.mxu2 %vm512_vm14, %v1909_v6  ;;  %1533 = vmatmul.msk.f32.gmra.mxu0 %vm490_vm0, %v1909_v6  ;;  %v449_v37 = vpop.permute.xlu1 %448  ;;  %v452_v39 = vpop.permute.xlu0 %451  ;;  %vm312_vm14 = vcmp.eq.s32.totalorder %v2071_v63, %v267_v32  ;;  %vm498_vm0 = vcmp.eq.s32.totalorder %v2071_v63, %v458_v42 }
  0xba   : > { %1560 = vmatmul.msk.f32.gmra.mxu3 %vm513_vm15, %v1909_v6  ;;  %1549 = vmatmul.msk.f32.gmra.mxu1 %vm491_vm1, %v1909_v6  ;;  %vm492_vm4 = vcmp.eq.s32.totalorder %v2071_v63, %v449_v37  ;;  %vm493_vm5 = vcmp.eq.s32.totalorder %v2074_v4, %v449_v37  ;;  %vm494_vm8 = vcmp.eq.s32.totalorder %v2071_v63, %v452_v39  ;;  %v912_v37 = vld [vmem:[%s2714_s3 + $0x8] sm:$0xff] }
  0xbb   : > { %vm495_vm9 = vcmp.eq.s32.totalorder %v2074_v4, %v452_v39  ;;  %vm313_vm15 = vcmp.eq.s32.totalorder %v2074_v4, %v267_v32  ;;  %vm499_vm1 = vcmp.eq.s32.totalorder %v2074_v4, %v458_v42 }
  0xbd   : > { %v288_v54 = vpop.permute.xlu2 %287 }
  0xc1   : > { %1545 = vmatmul.msk.f32.gmra.mxu2 %vm514_vm2, %v1909_v6  ;;  %1534 = vmatmul.msk.f32.gmra.mxu0 %vm492_vm4, %v1909_v6  ;;  %vm314_vm2 = vcmp.eq.s32.totalorder %v2071_v63, %v270_v36  ;;  %vm316_vm4 = vcmp.eq.s32.totalorder %v2071_v63, %v273_v35 }
  0xc2   : > { %1561 = vmatmul.msk.f32.gmra.mxu3 %vm515_vm3, %v1909_v6  ;;  %1550 = vmatmul.msk.f32.gmra.mxu1 %vm493_vm5, %v1909_v6  ;;  %v279_v41 = vpop.permute.xlu1 %278  ;;  %vm315_vm3 = vcmp.eq.s32.totalorder %v2074_v4, %v270_v36  ;;  %vm317_vm5 = vcmp.eq.s32.totalorder %v2074_v4, %v273_v35  ;;  %v285_v49 = vpop.permute.xlu0 %284  ;;  %v914_v35 = vld [vmem:[%s2714_s3 + $0x18] sm:$0xff]  ;;  %v911_v36 = vld [vmem:[%s2714_s3] sm:$0xff] }
  0xc3   : > { %1028 = vmatpush.msrb.mxu1 %v914_v35  ;;  %964 = vmatpush.msrb.mxu0 %v911_v36 }
  0xc5   : > { %v294_v11 = vpop.permute.xlu2 %293  ;;  %1029 = vmatpush.msrb.mxu1 %v912_v37 }
  0xc9   : > { %1546 = vmatmul.msk.f32.gmra.mxu2 %vm516_vm6, %v1909_v6  ;;  %1535 = vmatmul.msk.f32.gmra.mxu0 %vm494_vm8, %v1909_v6  ;;  %vm318_vm8 = vcmp.eq.s32.totalorder %v2071_v63, %v276_v38 }
  0xca   : > { %1562 = vmatmul.msk.f32.gmra.mxu3 %vm517_vm7, %v1909_v6  ;;  %1551 = vmatmul.msk.f32.gmra.mxu1 %vm495_vm9, %v1909_v6  ;;  %v282_v43 = vpop.permute.xlu1 %281  ;;  %vm319_vm9 = vcmp.eq.s32.totalorder %v2074_v4, %v276_v38  ;;  %v297_v19 = vpop.permute.xlu0 %296 }
  0xcd   : > { %v303_v31 = vpop.permute.xlu2 %302 }
  0xd1   : > { %1563 = vmatmul.msk.f32.vlgmr.msrb.gmra.mxu2 %vm310_vm10, %v1909_v6  ;;  %1536 = vmatmul.msk.f32.gmra.mxu0 %vm496_vm12, %v1909_v6  ;;  %vm320_vm10 = vcmp.eq.s32.totalorder %v2071_v63, %v279_v41  ;;  %vm322_vm12 = vcmp.eq.s32.totalorder %v2071_v63, %v282_v43 }
  0xd2   : > { %1579 = vmatmul.msk.f32.vlgmr.msrb.gmra.mxu3 %vm311_vm11, %v1909_v6  ;;  %1552 = vmatmul.msk.f32.gmra.mxu1 %vm497_vm13, %v1909_v6  ;;  %vm321_vm11 = vcmp.eq.s32.totalorder %v2074_v4, %v279_v41  ;;  %vm323_vm13 = vcmp.eq.s32.totalorder %v2074_v4, %v282_v43  ;;  %v306_v39 = vpop.permute.xlu0 %305 }
  0xd3   : > { %v461_v44 = vpop.permute.xlu1 %460 }
  0xd4   : > { %vm500_vm6 = vcmp.eq.s32.totalorder %v2071_v63, %v461_v44  ;;  %vm501_vm7 = vcmp.eq.s32.totalorder %v2074_v4, %v461_v44 }
  0xd9   : > { %1564 = vmatmul.msk.f32.gmra.mxu2 %vm312_vm14, %v1909_v6  ;;  %1537 = vmatmul.msk.f32.gmra.mxu0 %vm498_vm0, %v1909_v6  ;;  %vm324_vm14 = vcmp.eq.s32.totalorder %v2071_v63, %v285_v49  ;;  %vm326_vm0 = vcmp.eq.s32.totalorder %v2071_v63, %v288_v54 }
  0xda   : > { %1580 = vmatmul.msk.f32.gmra.mxu3 %vm313_vm15, %v1909_v6  ;;  %1553 = vmatmul.msk.f32.gmra.mxu1 %vm499_vm1, %v1909_v6  ;;  %vm325_vm15 = vcmp.eq.s32.totalorder %v2074_v4, %v285_v49  ;;  %vm327_vm1 = vcmp.eq.s32.totalorder %v2074_v4, %v288_v54 }
  0xdc   : > { %v291_v61 = vpop.permute.xlu1 %290 }
  0xe1   : > { %1565 = vmatmul.msk.f32.gmra.mxu2 %vm314_vm2, %v1909_v6  ;;  %1538 = vmatmul.msk.f32.gmra.mxu0 %vm500_vm6, %v1909_v6  ;;  %vm328_vm2 = vcmp.eq.s32.totalorder %v2071_v63, %v291_v61  ;;  %vm332_vm6 = vcmp.eq.s32.totalorder %v2071_v63, %v297_v19 }
  0xe2   : > { %1581 = vmatmul.msk.f32.gmra.mxu3 %vm315_vm3, %v1909_v6  ;;  %1554 = vmatmul.msk.f32.gmra.mxu1 %vm501_vm7, %v1909_v6  ;;  %vm329_vm3 = vcmp.eq.s32.totalorder %v2074_v4, %v291_v61  ;;  %vm333_vm7 = vcmp.eq.s32.totalorder %v2074_v4, %v297_v19 }
  0xe4   : > { %v300_v28 = vpop.permute.xlu1 %299 }
  0xe9   : > { %1566 = vmatmul.msk.f32.gmra.mxu2 %vm316_vm4, %v1909_v6  ;;  %vm330_vm4 = vcmp.eq.s32.totalorder %v2071_v63, %v294_v11 }
  0xea   : > { %1582 = vmatmul.msk.f32.gmra.mxu3 %vm317_vm5, %v1909_v6  ;;  %vm331_vm5 = vcmp.eq.s32.totalorder %v2074_v4, %v294_v11 }
  0xec   : > { %v309_v45 = vpop.permute.xlu1 %308 }
  0xf1   : > { %1567 = vmatmul.msk.f32.gmra.mxu2 %vm318_vm8, %v1909_v6  ;;  %vm334_vm8 = vcmp.eq.s32.totalorder %v2071_v63, %v300_v28 }
  0xf2   : > { %1583 = vmatmul.msk.f32.gmra.mxu3 %vm319_vm9, %v1909_v6  ;;  %vm335_vm9 = vcmp.eq.s32.totalorder %v2074_v4, %v300_v28 }
  0xf9   : > { %1568 = vmatmul.msk.f32.gmra.mxu2 %vm320_vm10, %v1909_v6  ;;  %vm336_vm10 = vcmp.eq.s32.totalorder %v2071_v63, %v303_v31 }
  0xfa   : > { %1584 = vmatmul.msk.f32.gmra.mxu3 %vm321_vm11, %v1909_v6  ;;  %vm337_vm11 = vcmp.eq.s32.totalorder %v2074_v4, %v303_v31 }
 0x101   : > { %1569 = vmatmul.msk.f32.gmra.mxu2 %vm322_vm12, %v1909_v6  ;;  %vm338_vm12 = vcmp.eq.s32.totalorder %v2071_v63, %v306_v39 }
 0x102   : > { %1585 = vmatmul.msk.f32.gmra.mxu3 %vm323_vm13, %v1909_v6  ;;  %vm339_vm13 = vcmp.eq.s32.totalorder %v2074_v4, %v306_v39 }
 0x109   : > { %1570 = vmatmul.msk.f32.gmra.mxu2 %vm324_vm14, %v1909_v6  ;;  %vm340_vm14 = vcmp.eq.s32.totalorder %v2071_v63, %v309_v45  ;;  %v2319_v63 = vld [vmem:[%s2713_s2] ss:$0 sm:$0xff] }
 0x10a   : > { %1586 = vmatmul.msk.f32.gmra.mxu3 %vm325_vm15, %v1909_v6  ;;  %vm341_vm15 = vcmp.eq.s32.totalorder %v2074_v4, %v309_v45 }
 0x111   : > { %1571 = vmatmul.msk.f32.gmra.mxu2 %vm326_vm0, %v1909_v6 }
 0x112   : > { %1587 = vmatmul.msk.f32.gmra.mxu3 %vm327_vm1, %v1909_v6 }
 0x114   : > { %v656_v59 = vpop.f32.mrf.mxu2  ;;  %v721_v60 = vpop.f32.mrf.mxu3 }
 0x115   : > { %v2212_v62 = vadd.f32 %v721_v60, %v656_v59 }
 0x119   : > { %1572 = vmatmul.msk.f32.gmra.mxu2 %vm328_vm2, %v1909_v6 }
 0x11a   : > { %1588 = vmatmul.msk.f32.gmra.mxu3 %vm329_vm3, %v1909_v6 }
 0x11c   : > { %v659_v5 = vpop.f32.mrf.mxu2  ;;  %v724_v7 = vpop.f32.mrf.mxu3 }
 0x11d   : > { %v2230_v8 = vadd.f32 %v724_v7, %v659_v5 }
 0x121   : > { %1573 = vmatmul.msk.f32.gmra.mxu2 %vm330_vm4, %v1909_v6 }
 0x122   : > { %1589 = vmatmul.msk.f32.gmra.mxu3 %vm331_vm5, %v1909_v6 }
 0x124   : > { %v662_v14 = vpop.f32.mrf.mxu2  ;;  %v727_v15 = vpop.f32.mrf.mxu3 }
 0x125   : > { %v2248_v16 = vadd.f32 %v727_v15, %v662_v14 }
 0x126   : > { %v632_v42 = vpop.f32.mrf.mxu0 }
 0x127   : > { %v697_v43 = vpop.f32.mrf.mxu1 }
 0x128   : > { %v698_v53 = vadd.f32 %v697_v43, %v632_v42 }
 0x129   : > { %1574 = vmatmul.msk.f32.gmra.mxu2 %vm332_vm6, %v1909_v6 }
 0x12a   : > { %1590 = vmatmul.msk.f32.gmra.mxu3 %vm333_vm7, %v1909_v6 }
 0x12c   : > { %v665_v22 = vpop.f32.mrf.mxu2 }
 0x12d   : > { %v730_v23 = vpop.f32.mrf.mxu3 }
 0x12e   : > { %v2266_v24 = vadd.f32 %v730_v23, %v665_v22  ;;  %v635_v48 = vpop.f32.mrf.mxu0 }
 0x12f   : > { %v700_v50 = vpop.f32.mrf.mxu1 }
 0x130   : > { %v701_v59 = vadd.f32 %v700_v50, %v635_v48 }
 0x131   : > { %1575 = vmatmul.msk.f32.gmra.mxu2 %vm334_vm8, %v1909_v6 }
 0x132   : > { %1591 = vmatmul.msk.f32.gmra.mxu3 %vm335_vm9, %v1909_v6 }
 0x134   : > { %v668_v30 = vpop.f32.mrf.mxu2 }
 0x135   : > { %v733_v32 = vpop.f32.mrf.mxu3 }
 0x136   : > { %v2284_v33 = vadd.f32 %v733_v32, %v668_v30  ;;  %v638_v57 = vpop.f32.mrf.mxu0 }
 0x137   : > { %v703_v58 = vpop.f32.mrf.mxu1 }
 0x138   : > { %v704_v7 = vadd.f32 %v703_v58, %v638_v57 }
 0x139   : > { %1576 = vmatmul.msk.f32.gmra.mxu2 %vm336_vm10, %v1909_v6 }
 0x13a   : > { %1592 = vmatmul.msk.f32.gmra.mxu3 %vm337_vm11, %v1909_v6 }
 0x13c   : > { %v671_v38 = vpop.f32.mrf.mxu2 }
 0x13d   : > { %v736_v40 = vpop.f32.mrf.mxu3 }
 0x13e   : > { %v2302_v41 = vadd.f32 %v736_v40, %v671_v38  ;;  %v641_v3 = vpop.f32.mrf.mxu0 }
 0x13f   : > { %v706_v5 = vpop.f32.mrf.mxu1 }
 0x140   : > { %v707_v19 = vadd.f32 %v706_v5, %v641_v3 }
 0x141   : > { %1577 = vmatmul.msk.f32.gmra.mxu2 %vm338_vm12, %v1909_v6 }
 0x142   : > { %1593 = vmatmul.msk.f32.gmra.mxu3 %vm339_vm13, %v1909_v6 }
 0x144   : > { %v674_v44 = vpop.f32.mrf.mxu2 }
 0x145   : > { %v739_v46 = vpop.f32.mrf.mxu3 }
 0x146   : > { %v2308_v47 = vadd.f32 %v739_v46, %v674_v44  ;;  %v644_v15 = vpop.f32.mrf.mxu0 }
 0x147   : > { %v709_v18 = vpop.f32.mrf.mxu1 }
 0x148   : > { %v710_v26 = vadd.f32 %v709_v18, %v644_v15 }
 0x149   : > { %1578 = vmatmul.msk.f32.gmra.mxu2 %vm340_vm14, %v1909_v6 }
 0x14a   : > { %1594 = vmatmul.msk.f32.gmra.mxu3 %vm341_vm15, %v1909_v6 }
 0x14c   : > { %v677_v49 = vpop.f32.mrf.mxu2 }
 0x14d   : > { %v742_v51 = vpop.f32.mrf.mxu3 }
 0x14e   : > { %v2314_v52 = vadd.f32 %v742_v51, %v677_v49  ;;  %v647_v28 = vpop.f32.mrf.mxu0 }
 0x14f   : > { %v712_v30 = vpop.f32.mrf.mxu1 }
 0x150   : > { %v713_v36 = vadd.f32 %v712_v30, %v647_v28 }
 0x154   : > { %v762_v54 = vpop.f32.mrf.mxu2 }
 0x155   : > { %v763_v55 = vadd.f32 %v762_v54, %v698_v53  ;;  %v827_v56 = vpop.f32.mrf.mxu3 }
 0x156   : > { %v650_v43 = vpop.f32.mrf.mxu0 }
 0x157   : > { %v828_v4 = vadd.f32 %v827_v56, %v763_v55  ;;  %v715_v44 = vpop.f32.mrf.mxu1 }
 0x158   : > { %v716_v48 = vadd.f32 %v715_v44, %v650_v43 }
 0x159   : > { %v879_v6 = vadd.f32 %v2319_v63, %v828_v4 }
 0x15b   : > { %v895_v60 = vmax.f32 %v879_v6, 0.0 }
 0x15c   : > { %v765_v61 = vpop.f32.mrf.mxu2 }
 0x15d   : > { %v766_v0 = vadd.f32 %v765_v61, %v701_v59  ;;  %v830_v1 = vpop.f32.mrf.mxu3  ;;  %965 = vmatmul.f32.vlgmr.msrb.gmra.mxu0 %v895_v60  ;;  %1030 = vmatmul.f32.vlgmr.msrb.gmra.mxu1 %v895_v60 }
 0x15e   : > { %v653_v54 = vpop.f32.mrf.mxu0 }
 0x15f   : > { %v831_v2 = vadd.f32 %v830_v1, %v766_v0  ;;  %v718_v55 = vpop.f32.mrf.mxu1 }
 0x160   : > { %v719_v57 = vadd.f32 %v718_v55, %v653_v54 }
 0x161   : > { %v880_v9 = vadd.f32 %v2319_v63, %v831_v2 }
 0x163   : > { %v896_v10 = vmax.f32 %v880_v9, 0.0 }
 0x164   : > { %v768_v11 = vpop.f32.mrf.mxu2 }
 0x165   : > { %v769_v12 = vadd.f32 %v768_v11, %v704_v7  ;;  %v833_v13 = vpop.f32.mrf.mxu3  ;;  %968 = vmatmul.f32.gmra.mxu0 %v896_v10  ;;  %1033 = vmatmul.f32.gmra.mxu1 %v896_v10 }
 0x167   : > { %v834_v14 = vadd.f32 %v833_v13, %v769_v12 }
 0x169   : > { %v881_v17 = vadd.f32 %v2319_v63, %v834_v14 }
 0x16b   : > { %v897_v20 = vmax.f32 %v881_v17, 0.0 }
 0x16c   : > { %v771_v21 = vpop.f32.mrf.mxu2 }
 0x16d   : > { %v772_v22 = vadd.f32 %v771_v21, %v707_v19  ;;  %v836_v23 = vpop.f32.mrf.mxu3  ;;  %971 = vmatmul.f32.gmra.mxu0 %v897_v20  ;;  %1036 = vmatmul.f32.gmra.mxu1 %v897_v20 }
 0x16f   : > { %v837_v25 = vadd.f32 %v836_v23, %v772_v22 }
 0x171   : > { %v882_v27 = vadd.f32 %v2319_v63, %v837_v25 }
 0x173   : > { %v898_v29 = vmax.f32 %v882_v27, 0.0 }
 0x174   : > { %v774_v31 = vpop.f32.mrf.mxu2 }
 0x175   : > { %v775_v32 = vadd.f32 %v774_v31, %v710_v26  ;;  %v839_v34 = vpop.f32.mrf.mxu3  ;;  %974 = vmatmul.f32.gmra.mxu0 %v898_v29  ;;  %1039 = vmatmul.f32.gmra.mxu1 %v898_v29 }
 0x177   : > { %v840_v35 = vadd.f32 %v839_v34, %v775_v32 }
 0x179   : > { %v883_v37 = vadd.f32 %v2319_v63, %v840_v35 }
 0x17b   : > { %v899_v38 = vmax.f32 %v883_v37, 0.0 }
 0x17c   : > { %v777_v39 = vpop.f32.mrf.mxu2 }
 0x17d   : > { %v778_v40 = vadd.f32 %v777_v39, %v713_v36  ;;  %v842_v42 = vpop.f32.mrf.mxu3  ;;  %977 = vmatmul.f32.gmra.mxu0 %v899_v38  ;;  %1042 = vmatmul.f32.gmra.mxu1 %v899_v38 }
 0x17f   : > { %v843_v45 = vadd.f32 %v842_v42, %v778_v40 }
 0x181   : > { %v884_v46 = vadd.f32 %v2319_v63, %v843_v45 }
 0x183   : > { %v900_v49 = vmax.f32 %v884_v46, 0.0 }
 0x184   : > { %v780_v50 = vpop.f32.mrf.mxu2 }
 0x185   : > { %v781_v51 = vadd.f32 %v780_v50, %v716_v48  ;;  %v845_v53 = vpop.f32.mrf.mxu3  ;;  %980 = vmatmul.f32.gmra.mxu0 %v900_v49  ;;  %1045 = vmatmul.f32.gmra.mxu1 %v900_v49 }
 0x187   : > { %v846_v56 = vadd.f32 %v845_v53, %v781_v51 }
 0x189   : > { %v885_v58 = vadd.f32 %v2319_v63, %v846_v56 }
 0x18b   : > { %v901_v4 = vmax.f32 %v885_v58, 0.0 }
 0x18c   : > { %v783_v59 = vpop.f32.mrf.mxu2 }
 0x18d   : > { %v784_v6 = vadd.f32 %v783_v59, %v719_v57  ;;  %v848_v60 = vpop.f32.mrf.mxu3  ;;  %983 = vmatmul.f32.gmra.mxu0 %v901_v4  ;;  %1048 = vmatmul.f32.gmra.mxu1 %v901_v4 }
 0x18f   : > { %v849_v61 = vadd.f32 %v848_v60, %v784_v6 }
 0x191   : > { %v886_v0 = vadd.f32 %v2319_v63, %v849_v61 }
 0x193   : > { %v902_v1 = vmax.f32 %v886_v0, 0.0 }
 0x194   : > { %v786_v2 = vpop.f32.mrf.mxu2 }
 0x195   : > { %v787_v3 = vadd.f32 %v786_v2, %v2212_v62  ;;  %v851_v5 = vpop.f32.mrf.mxu3  ;;  %986 = vmatmul.f32.gmra.mxu0 %v902_v1  ;;  %1051 = vmatmul.f32.gmra.mxu1 %v902_v1 }
 0x197   : > { %v852_v7 = vadd.f32 %v851_v5, %v787_v3 }
 0x199   : > { %v887_v9 = vadd.f32 %v2319_v63, %v852_v7 }
 0x19b   : > { %v903_v10 = vmax.f32 %v887_v9, 0.0 }
 0x19c   : > { %v789_v11 = vpop.f32.mrf.mxu2 }
 0x19d   : > { %v790_v12 = vadd.f32 %v789_v11, %v2230_v8  ;;  %v854_v13 = vpop.f32.mrf.mxu3  ;;  %989 = vmatmul.f32.gmra.mxu0 %v903_v10  ;;  %1054 = vmatmul.f32.gmra.mxu1 %v903_v10 }
 0x19f   : > { %v855_v14 = vadd.f32 %v854_v13, %v790_v12 }
 0x1a1   : > { %v888_v15 = vadd.f32 %v2319_v63, %v855_v14 }
 0x1a3   : > { %v904_v17 = vmax.f32 %v888_v15, 0.0 }
 0x1a4   : > { %v792_v18 = vpop.f32.mrf.mxu2 }
 0x1a5   : > { %v793_v62 = vadd.f32 %v792_v18, %v2248_v16  ;;  %v857_v19 = vpop.f32.mrf.mxu3  ;;  %992 = vmatmul.f32.gmra.mxu0 %v904_v17  ;;  %1057 = vmatmul.f32.gmra.mxu1 %v904_v17 }
 0x1a7   : > { %v858_v20 = vadd.f32 %v857_v19, %v793_v62 }
 0x1a9   : > { %v889_v21 = vadd.f32 %v2319_v63, %v858_v20 }
 0x1ab   : > { %v905_v22 = vmax.f32 %v889_v21, 0.0 }
 0x1ac   : > { %v795_v23 = vpop.f32.mrf.mxu2 }
 0x1ad   : > { %v796_v8 = vadd.f32 %v795_v23, %v2266_v24  ;;  %v860_v25 = vpop.f32.mrf.mxu3  ;;  %995 = vmatmul.f32.gmra.mxu0 %v905_v22  ;;  %1060 = vmatmul.f32.gmra.mxu1 %v905_v22 }
 0x1af   : > { %v861_v26 = vadd.f32 %v860_v25, %v796_v8 }
 0x1b1   : > { %v890_v27 = vadd.f32 %v2319_v63, %v861_v26 }
 0x1b3   : > { %v906_v28 = vmax.f32 %v890_v27, 0.0 }
 0x1b4   : > { %v798_v29 = vpop.f32.mrf.mxu2 }
 0x1b5   : > { %v799_v16 = vadd.f32 %v798_v29, %v2284_v33  ;;  %v863_v30 = vpop.f32.mrf.mxu3  ;;  %998 = vmatmul.f32.gmra.mxu0 %v906_v28  ;;  %1063 = vmatmul.f32.gmra.mxu1 %v906_v28 }
 0x1b7   : > { %v864_v31 = vadd.f32 %v863_v30, %v799_v16 }
 0x1b9   : > { %v891_v32 = vadd.f32 %v2319_v63, %v864_v31 }
 0x1bb   : > { %v907_v34 = vmax.f32 %v891_v32, 0.0 }
 0x1bc   : > { %v801_v35 = vpop.f32.mrf.mxu2 }
 0x1bd   : > { %v802_v24 = vadd.f32 %v801_v35, %v2302_v41  ;;  %v866_v36 = vpop.f32.mrf.mxu3  ;;  %1001 = vmatmul.f32.gmra.mxu0 %v907_v34  ;;  %1066 = vmatmul.f32.gmra.mxu1 %v907_v34 }
 0x1bf   : > { %v867_v37 = vadd.f32 %v866_v36, %v802_v24 }
 0x1c1   : > { %v892_v38 = vadd.f32 %v2319_v63, %v867_v37 }
 0x1c3   : > { %v908_v39 = vmax.f32 %v892_v38, 0.0 }
 0x1c4   : > { %v804_v40 = vpop.f32.mrf.mxu2 }
 0x1c5   : > { %v805_v33 = vadd.f32 %v804_v40, %v2308_v47  ;;  %v869_v42 = vpop.f32.mrf.mxu3  ;;  %1004 = vmatmul.f32.gmra.mxu0 %v908_v39  ;;  %1069 = vmatmul.f32.gmra.mxu1 %v908_v39  ;;  %v943_v47 = vld [vmem:[%s2715_s4] sm:$0x3] }
 0x1c6   : > { %v2348_v53 = vperm.slane %v943_v47, 0  ;;  %v2350_v54 = vperm.slane %v943_v47, 1 }
 0x1c7   : > { %v870_v43 = vadd.f32 %v869_v42, %v805_v33 }
 0x1c9   : > { %v893_v44 = vadd.f32 %v2319_v63, %v870_v43 }
 0x1cb   : > { %v909_v45 = vmax.f32 %v893_v44, 0.0 }
 0x1cc   : > { %v807_v46 = vpop.f32.mrf.mxu2 }
 0x1cd   : > { %v808_v41 = vadd.f32 %v807_v46, %v2314_v52  ;;  %1007 = vmatmul.f32.gmra.mxu0 %v909_v45  ;;  %1072 = vmatmul.f32.gmra.mxu1 %v909_v45  ;;  %v872_v48 = vpop.f32.mrf.mxu3 }
 0x1cf   : > { %v873_v49 = vadd.f32 %v872_v48, %v808_v41 }
 0x1d1   : > { %v894_v50 = vadd.f32 %v2319_v63, %v873_v49 }
 0x1d3   : > { %v910_v51 = vmax.f32 %v894_v50, 0.0 }
 0x1d5   : > { %1010 = vmatmul.f32.gmra.mxu0 %v910_v51  ;;  %1075 = vmatmul.f32.gmra.mxu1 %v910_v51 }
 0x1da   : > { %v966_v55 = vpop.f32.mrf.mxu0  ;;  %v1031_v56 = vpop.f32.mrf.mxu1 }
 0x1db   : > { %v2353_v52 = vadd.f32 %v966_v55, %v2348_v53  ;;  %v2356_v57 = vadd.f32 %v1031_v56, %v2350_v54 }
 0x1dd   : > { %v1079_v63 = vmax.f32 %v2353_v52, %v2356_v57 }
 0x1df   : > { %1080 = vmax.xlane.f32.xlu2 %v1079_v63 }
 0x1e2   : > { %v969_v58 = vpop.f32.mrf.mxu0  ;;  %v1034_v4 = vpop.f32.mrf.mxu1 }
 0x1e3   : > { %v2361_v59 = vadd.f32 %v969_v58, %v2348_v53  ;;  %v2364_v6 = vadd.f32 %v1034_v4, %v2350_v54 }
 0x1e5   : > { %v1082_v60 = vmax.f32 %v2361_v59, %v2364_v6 }
 0x1e7   : > { %1083 = vmax.xlane.f32.xlu0 %v1082_v60 }
 0x1ea   : > { %v972_v61 = vpop.f32.mrf.mxu0  ;;  %v1037_v0 = vpop.f32.mrf.mxu1 }
 0x1eb   : > { %v2369_v1 = vadd.f32 %v972_v61, %v2348_v53  ;;  %v2372_v2 = vadd.f32 %v1037_v0, %v2350_v54 }
 0x1ed   : > { %v1085_v3 = vmax.f32 %v2369_v1, %v2372_v2 }
 0x1ef   : > { %1086 = vmax.xlane.f32.xlu1 %v1085_v3 }
 0x1f2   : > { %v975_v5 = vpop.f32.mrf.mxu0  ;;  %v1040_v7 = vpop.f32.mrf.mxu1 }
 0x1f3   : > { %v2377_v9 = vadd.f32 %v975_v5, %v2348_v53  ;;  %v2380_v10 = vadd.f32 %v1040_v7, %v2350_v54 }
 0x1f5   : > { %v1088_v11 = vmax.f32 %v2377_v9, %v2380_v10 }
 0x1f7   : > { %1089 = vmax.xlane.f32.xlu2 %v1088_v11 }
 0x1fa   : > { %v978_v12 = vpop.f32.mrf.mxu0  ;;  %v1043_v13 = vpop.f32.mrf.mxu1 }
 0x1fb   : > { %v2385_v14 = vadd.f32 %v978_v12, %v2348_v53  ;;  %v2388_v15 = vadd.f32 %v1043_v13, %v2350_v54 }
 0x1fd   : > { %v1091_v17 = vmax.f32 %v2385_v14, %v2388_v15 }
 0x1ff   : > { %1092 = vmax.xlane.f32.xlu2 %v1091_v17 }
 0x202   : > { %v981_v18 = vpop.f32.mrf.mxu0  ;;  %v1046_v62 = vpop.f32.mrf.mxu1 }
 0x203   : > { %v2393_v19 = vadd.f32 %v981_v18, %v2348_v53  ;;  %v2396_v20 = vadd.f32 %v1046_v62, %v2350_v54 }
 0x205   : > { %v1094_v21 = vmax.f32 %v2393_v19, %v2396_v20 }
 0x207   : > { %1095 = vmax.xlane.f32.xlu0 %v1094_v21 }
 0x20a   : > { %v984_v22 = vpop.f32.mrf.mxu0  ;;  %v1049_v23 = vpop.f32.mrf.mxu1 }
 0x20b   : > { %v2401_v8 = vadd.f32 %v984_v22, %v2348_v53  ;;  %v2404_v25 = vadd.f32 %v1049_v23, %v2350_v54 }
 0x20d   : > { %v1097_v26 = vmax.f32 %v2401_v8, %v2404_v25 }
 0x20f   : > { %1098 = vmax.xlane.f32.xlu1 %v1097_v26 }
 0x212   : > { %v987_v27 = vpop.f32.mrf.mxu0  ;;  %v1052_v28 = vpop.f32.mrf.mxu1 }
 0x213   : > { %v2409_v29 = vadd.f32 %v987_v27, %v2348_v53  ;;  %v2412_v16 = vadd.f32 %v1052_v28, %v2350_v54 }
 0x215   : > { %v1100_v30 = vmax.f32 %v2409_v29, %v2412_v16 }
 0x217   : > { %1101 = vmax.xlane.f32.xlu2 %v1100_v30 }
 0x21a   : > { %v990_v31 = vpop.f32.mrf.mxu0  ;;  %v1055_v32 = vpop.f32.mrf.mxu1 }
 0x21b   : > { %v2417_v34 = vadd.f32 %v990_v31, %v2348_v53  ;;  %v2420_v35 = vadd.f32 %v1055_v32, %v2350_v54 }
 0x21d   : > { %v1103_v24 = vmax.f32 %v2417_v34, %v2420_v35 }
 0x21f   : > { %1104 = vmax.xlane.f32.xlu0 %v1103_v24 }
 0x222   : > { %v993_v36 = vpop.f32.mrf.mxu0  ;;  %v1058_v37 = vpop.f32.mrf.mxu1 }
 0x223   : > { %v2425_v38 = vadd.f32 %v993_v36, %v2348_v53  ;;  %v2428_v39 = vadd.f32 %v1058_v37, %v2350_v54 }
 0x225   : > { %v1106_v40 = vmax.f32 %v2425_v38, %v2428_v39 }
 0x227   : > { %1107 = vmax.xlane.f32.xlu1 %v1106_v40 }
 0x22a   : > { %v996_v33 = vpop.f32.mrf.mxu0  ;;  %v1061_v42 = vpop.f32.mrf.mxu1 }
 0x22b   : > { %v2433_v43 = vadd.f32 %v996_v33, %v2348_v53  ;;  %v2436_v44 = vadd.f32 %v1061_v42, %v2350_v54 }
 0x22d   : > { %v1109_v45 = vmax.f32 %v2433_v43, %v2436_v44 }
 0x22f   : > { %1110 = vmax.xlane.f32.xlu2 %v1109_v45 }
 0x232   : > { %v999_v46 = vpop.f32.mrf.mxu0  ;;  %v1064_v41 = vpop.f32.mrf.mxu1 }
 0x233   : > { %v2441_v48 = vadd.f32 %v999_v46, %v2348_v53  ;;  %v2444_v49 = vadd.f32 %v1064_v41, %v2350_v54 }
 0x235   : > { %v1112_v50 = vmax.f32 %v2441_v48, %v2444_v49 }
 0x237   : > { %1113 = vmax.xlane.f32.xlu0 %v1112_v50 }
 0x23a   : > { %v1002_v51 = vpop.f32.mrf.mxu0  ;;  %v1067_v47 = vpop.f32.mrf.mxu1 }
 0x23b   : > { %v2449_v55 = vadd.f32 %v1002_v51, %v2348_v53  ;;  %v2452_v56 = vadd.f32 %v1067_v47, %v2350_v54 }
 0x23d   : > { %v1115_v63 = vmax.f32 %v2449_v55, %v2452_v56 }
 0x23f   : > { %1116 = vmax.xlane.f32.xlu1 %v1115_v63 }
 0x242   : > { %v1005_v58 = vpop.f32.mrf.mxu0  ;;  %v1070_v4 = vpop.f32.mrf.mxu1 }
 0x243   : > { %v2457_v60 = vadd.f32 %v1005_v58, %v2348_v53  ;;  %v2460_v61 = vadd.f32 %v1070_v4, %v2350_v54 }
 0x245   : > { %v1118_v0 = vmax.f32 %v2457_v60, %v2460_v61 }
 0x247   : > { %1119 = vmax.xlane.f32.xlu2 %v1118_v0 }
 0x24a   : > { %v1008_v3 = vpop.f32.mrf.mxu0  ;;  %v1073_v5 = vpop.f32.mrf.mxu1 }
 0x24b   : > { %v2465_v7 = vadd.f32 %v1008_v3, %v2348_v53  ;;  %v2468_v11 = vadd.f32 %v1073_v5, %v2350_v54 }
 0x24d   : > { %v1121_v12 = vmax.f32 %v2465_v7, %v2468_v11 }
 0x24f   : > { %1122 = vmax.xlane.f32.xlu0 %v1121_v12 }
 0x252   : > { %v1011_v13 = vpop.f32.mrf.mxu0  ;;  %v1076_v17 = vpop.f32.mrf.mxu1 }
 0x253   : > { %v2473_v18 = vadd.f32 %v1011_v13, %v2348_v53  ;;  %v2476_v62 = vadd.f32 %v1076_v17, %v2350_v54  ;;  %v1081_v21 = vpop.xlane.xlu2 %1080 }
 0x254   : > { %v2479_v22 = vsub.f32 %v2353_v52, %v1081_v21  ;;  %v2482_v23 = vsub.f32 %v2356_v57, %v1081_v21 }
 0x255   : > { %v1124_v26 = vmax.f32 %v2473_v18, %v2476_v62 }
 0x256   : > { %v1159_v27 = vmul.f32 1.442695, %v2479_v22  ;;  %v1161_v28 = vmul.f32 1.442695, %v2482_v23 }
 0x257   : > { %1125 = vmax.xlane.f32.xlu1 %v1124_v26 }
 0x258   : > { %1710 = vpow2.f32 %v1159_v27 }
 0x259   : > { %1712 = vpow2.f32 %v1161_v28 }
 0x25a   : > { %v1084_v53 = vpop.xlane.xlu0 %1083 }
 0x25b   : > { %v2489_v54 = vsub.f32 %v2361_v59, %v1084_v53  ;;  %v2492_v52 = vsub.f32 %v2364_v6, %v1084_v53 }
 0x25d   : > { %v1163_v57 = vmul.f32 1.442695, %v2489_v54  ;;  %v1165_v30 = vmul.f32 1.442695, %v2492_v52 }
 0x25e   : > { %v1711_v31 = vpop.eup %1710 }
 0x25f   : > { %v1713_v32 = vpop.eup %1712  ;;  %1714 = vpow2.f32 %v1163_v57 }
 0x260   : > { %1716 = vpow2.f32 %v1165_v30  ;;  %v1223_v24 = vadd.f32 %v1713_v32, %v1711_v31 }
 0x262   : > { %1224 = vadd.xlane.f32.xlu2 %v1223_v24  ;;  %v1087_v36 = vpop.xlane.xlu1 %1086 }
 0x263   : > { %v2497_v37 = vsub.f32 %v2369_v1, %v1087_v36  ;;  %v2500_v59 = vsub.f32 %v2372_v2, %v1087_v36 }
 0x265   : > { %v1715_v40 = vpop.eup %1714  ;;  %v1167_v6 = vmul.f32 1.442695, %v2497_v37  ;;  %v1169_v33 = vmul.f32 1.442695, %v2500_v59 }
 0x266   : > { %v1717_v42 = vpop.eup %1716 }
 0x267   : > { %1718 = vpow2.f32 %v1167_v6  ;;  %v1226_v45 = vadd.f32 %v1717_v42, %v1715_v40 }
 0x268   : > { %1720 = vpow2.f32 %v1169_v33 }
 0x269   : > { %1227 = vadd.xlane.f32.xlu0 %v1226_v45 }
 0x26a   : > { %v1090_v46 = vpop.xlane.xlu2 %1089 }
 0x26b   : > { %v2505_v41 = vsub.f32 %v2377_v9, %v1090_v46  ;;  %v2508_v1 = vsub.f32 %v2380_v10, %v1090_v46 }
 0x26d   : > { %v1719_v50 = vpop.eup %1718  ;;  %v1171_v2 = vmul.f32 1.442695, %v2505_v41  ;;  %v1173_v51 = vmul.f32 1.442695, %v2508_v1 }
 0x26e   : > { %v1721_v47 = vpop.eup %1720 }
 0x26f   : > { %1722 = vpow2.f32 %v1171_v2  ;;  %v1229_v63 = vadd.f32 %v1721_v47, %v1719_v50 }
 0x270   : > { %1724 = vpow2.f32 %v1173_v51 }
 0x271   : > { %1230 = vadd.xlane.f32.xlu1 %v1229_v63 }
 0x272   : > { %v1093_v58 = vpop.xlane.xlu2 %1092 }
 0x273   : > { %v2513_v4 = vsub.f32 %v2385_v14, %v1093_v58  ;;  %v2516_v9 = vsub.f32 %v2388_v15, %v1093_v58 }
 0x275   : > { %v1723_v0 = vpop.eup %1722  ;;  %v1175_v10 = vmul.f32 1.442695, %v2513_v4  ;;  %v1177_v3 = vmul.f32 1.442695, %v2516_v9 }
 0x276   : > { %v1725_v5 = vpop.eup %1724 }
 0x277   : > { %1726 = vpow2.f32 %v1175_v10  ;;  %v1232_v12 = vadd.f32 %v1725_v5, %v1723_v0 }
 0x278   : > { %1728 = vpow2.f32 %v1177_v3 }
 0x279   : > { %1233 = vadd.xlane.f32.xlu2 %v1232_v12 }
 0x27a   : > { %v1096_v13 = vpop.xlane.xlu0 %1095 }
 0x27b   : > { %v2521_v17 = vsub.f32 %v2393_v19, %v1096_v13  ;;  %v2524_v14 = vsub.f32 %v2396_v20, %v1096_v13 }
 0x27d   : > { %v1727_v21 = vpop.eup %1726  ;;  %v1179_v15 = vmul.f32 1.442695, %v2521_v17  ;;  %v1181_v26 = vmul.f32 1.442695, %v2524_v14 }
 0x27e   : > { %v1729_v27 = vpop.eup %1728 }
 0x27f   : > { %1730 = vpow2.f32 %v1179_v15  ;;  %v1235_v28 = vadd.f32 %v1729_v27, %v1727_v21 }
 0x280   : > { %1732 = vpow2.f32 %v1181_v26 }
 0x281   : > { %1236 = vadd.xlane.f32.xlu0 %v1235_v28 }
 0x282   : > { %v1099_v53 = vpop.xlane.xlu1 %1098 }
 0x283   : > { %v2529_v57 = vsub.f32 %v2401_v8, %v1099_v53  ;;  %v2532_v19 = vsub.f32 %v2404_v25, %v1099_v53 }
 0x285   : > { %v1731_v30 = vpop.eup %1730  ;;  %v1183_v20 = vmul.f32 1.442695, %v2529_v57  ;;  %v1185_v31 = vmul.f32 1.442695, %v2532_v19 }
 0x286   : > { %v1733_v32 = vpop.eup %1732 }
 0x287   : > { %1734 = vpow2.f32 %v1183_v20  ;;  %v1238_v24 = vadd.f32 %v1733_v32, %v1731_v30 }
 0x288   : > { %1736 = vpow2.f32 %v1185_v31 }
 0x289   : > { %1239 = vadd.xlane.f32.xlu1 %v1238_v24 }
 0x28a   : > { %v1102_v36 = vpop.xlane.xlu2 %1101 }
 0x28b   : > { %v2537_v40 = vsub.f32 %v2409_v29, %v1102_v36  ;;  %v2540_v8 = vsub.f32 %v2412_v16, %v1102_v36 }
 0x28d   : > { %v1735_v6 = vpop.eup %1734  ;;  %v1187_v25 = vmul.f32 1.442695, %v2537_v40  ;;  %v1189_v33 = vmul.f32 1.442695, %v2540_v8 }
 0x28e   : > { %v1737_v42 = vpop.eup %1736 }
 0x28f   : > { %1738 = vpow2.f32 %v1187_v25  ;;  %v1241_v45 = vadd.f32 %v1737_v42, %v1735_v6 }
 0x290   : > { %1740 = vpow2.f32 %v1189_v33 }
 0x291   : > { %1242 = vadd.xlane.f32.xlu2 %v1241_v45 }
 0x292   : > { %v1105_v46 = vpop.xlane.xlu0 %1104 }
 0x293   : > { %v2545_v50 = vsub.f32 %v2417_v34, %v1105_v46  ;;  %v2548_v29 = vsub.f32 %v2420_v35, %v1105_v46 }
 0x295   : > { %v1739_v2 = vpop.eup %1738  ;;  %v1191_v16 = vmul.f32 1.442695, %v2545_v50  ;;  %v1193_v51 = vmul.f32 1.442695, %v2548_v29 }
 0x296   : > { %v1741_v47 = vpop.eup %1740 }
 0x297   : > { %1742 = vpow2.f32 %v1191_v16  ;;  %v1244_v63 = vadd.f32 %v1741_v47, %v1739_v2 }
 0x298   : > { %1744 = vpow2.f32 %v1193_v51 }
 0x299   : > { %1245 = vadd.xlane.f32.xlu0 %v1244_v63 }
 0x29a   : > { %v1108_v58 = vpop.xlane.xlu1 %1107 }
 0x29b   : > { %v2553_v0 = vsub.f32 %v2425_v38, %v1108_v58  ;;  %v2556_v34 = vsub.f32 %v2428_v39, %v1108_v58 }
 0x29d   : > { %v1743_v10 = vpop.eup %1742  ;;  %v1195_v35 = vmul.f32 1.442695, %v2553_v0  ;;  %v1197_v3 = vmul.f32 1.442695, %v2556_v34 }
 0x29e   : > { %v1745_v5 = vpop.eup %1744 }
 0x29f   : > { %1746 = vpow2.f32 %v1195_v35  ;;  %v1247_v12 = vadd.f32 %v1745_v5, %v1743_v10 }
 0x2a0   : > { %1748 = vpow2.f32 %v1197_v3 }
 0x2a1   : > { %1248 = vadd.xlane.f32.xlu1 %v1247_v12 }
 0x2a2   : > { %v1111_v13 = vpop.xlane.xlu2 %1110 }
 0x2a3   : > { %v2561_v21 = vsub.f32 %v2433_v43, %v1111_v13  ;;  %v2564_v38 = vsub.f32 %v2436_v44, %v1111_v13 }
 0x2a5   : > { %v1747_v15 = vpop.eup %1746  ;;  %v1199_v39 = vmul.f32 1.442695, %v2561_v21  ;;  %v1201_v26 = vmul.f32 1.442695, %v2564_v38 }
 0x2a6   : > { %v1749_v27 = vpop.eup %1748 }
 0x2a7   : > { %1750 = vpow2.f32 %v1199_v39  ;;  %v1250_v28 = vadd.f32 %v1749_v27, %v1747_v15 }
 0x2a8   : > { %1752 = vpow2.f32 %v1201_v26 }
 0x2a9   : > { %1251 = vadd.xlane.f32.xlu2 %v1250_v28 }
 0x2aa   : > { %v1114_v53 = vpop.xlane.xlu0 %1113 }
 0x2ab   : > { %v2569_v30 = vsub.f32 %v2441_v48, %v1114_v53  ;;  %v2572_v43 = vsub.f32 %v2444_v49, %v1114_v53 }
 0x2ad   : > { %v1751_v20 = vpop.eup %1750  ;;  %v1203_v44 = vmul.f32 1.442695, %v2569_v30  ;;  %v1205_v31 = vmul.f32 1.442695, %v2572_v43 }
 0x2ae   : > { %v1753_v32 = vpop.eup %1752 }
 0x2af   : > { %1754 = vpow2.f32 %v1203_v44  ;;  %v1253_v24 = vadd.f32 %v1753_v32, %v1751_v20 }
 0x2b0   : > { %1756 = vpow2.f32 %v1205_v31 }
 0x2b1   : > { %1254 = vadd.xlane.f32.xlu0 %v1253_v24 }
 0x2b2   : > { %v1117_v36 = vpop.xlane.xlu1 %1116 }
 0x2b3   : > { %v2577_v6 = vsub.f32 %v2449_v55, %v1117_v36  ;;  %v2580_v48 = vsub.f32 %v2452_v56, %v1117_v36 }
 0x2b5   : > { %v1755_v25 = vpop.eup %1754  ;;  %v1207_v49 = vmul.f32 1.442695, %v2577_v6  ;;  %v1209_v33 = vmul.f32 1.442695, %v2580_v48 }
 0x2b6   : > { %v1757_v42 = vpop.eup %1756 }
 0x2b7   : > { %1758 = vpow2.f32 %v1207_v49  ;;  %v1256_v45 = vadd.f32 %v1757_v42, %v1755_v25 }
 0x2b8   : > { %1760 = vpow2.f32 %v1209_v33 }
 0x2b9   : > { %1257 = vadd.xlane.f32.xlu1 %v1256_v45 }
 0x2ba   : > { %v1120_v46 = vpop.xlane.xlu2 %1119 }
 0x2bb   : > { %v2585_v2 = vsub.f32 %v2457_v60, %v1120_v46  ;;  %v2588_v55 = vsub.f32 %v2460_v61, %v1120_v46 }
 0x2bd   : > { %v1759_v16 = vpop.eup %1758  ;;  %v1211_v56 = vmul.f32 1.442695, %v2585_v2  ;;  %v1213_v51 = vmul.f32 1.442695, %v2588_v55 }
 0x2be   : > { %v1761_v47 = vpop.eup %1760 }
 0x2bf   : > { %1762 = vpow2.f32 %v1211_v56  ;;  %v1259_v63 = vadd.f32 %v1761_v47, %v1759_v16 }
 0x2c0   : > { %1764 = vpow2.f32 %v1213_v51 }
 0x2c1   : > { %1260 = vadd.xlane.f32.xlu2 %v1259_v63 }
 0x2c2   : > { %v1123_v58 = vpop.xlane.xlu0 %1122 }
 0x2c3   : > { %v2593_v10 = vsub.f32 %v2465_v7, %v1123_v58  ;;  %v2596_v60 = vsub.f32 %v2468_v11, %v1123_v58 }
 0x2c5   : > { %v1763_v35 = vpop.eup %1762  ;;  %v1215_v61 = vmul.f32 1.442695, %v2593_v10  ;;  %v1217_v3 = vmul.f32 1.442695, %v2596_v60 }
 0x2c6   : > { %v1765_v5 = vpop.eup %1764 }
 0x2c7   : > { %1766 = vpow2.f32 %v1215_v61  ;;  %v1262_v12 = vadd.f32 %v1765_v5, %v1763_v35 }
 0x2c8   : > { %1768 = vpow2.f32 %v1217_v3 }
 0x2c9   : > { %1263 = vadd.xlane.f32.xlu0 %v1262_v12 }
 0x2ca   : > { %v1126_v13 = vpop.xlane.xlu1 %1125 }
 0x2cb   : > { %v2601_v15 = vsub.f32 %v2473_v18, %v1126_v13  ;;  %v2604_v7 = vsub.f32 %v2476_v62, %v1126_v13 }
 0x2cd   : > { %v1767_v11 = vpop.eup %1766  ;;  %v1219_v39 = vmul.f32 1.442695, %v2601_v15  ;;  %v1221_v26 = vmul.f32 1.442695, %v2604_v7 }
 0x2ce   : > { %v1769_v27 = vpop.eup %1768 }
 0x2cf   : > { %1770 = vpow2.f32 %v1219_v39  ;;  %v1265_v28 = vadd.f32 %v1769_v27, %v1767_v11 }
 0x2d0   : > { %1772 = vpow2.f32 %v1221_v26 }
 0x2d1   : > { %1266 = vadd.xlane.f32.xlu1 %v1265_v28 }
 0x2d5   : > { %v1771_v53 = vpop.eup %1770  ;;  %v1225_v20 = vpop.xlane.xlu2 %1224 }
 0x2d6   : > { %v1773_v44 = vpop.eup %1772  ;;  %1774 = vlog2.f32 %v1225_v20 }
 0x2d7   : > { %v1268_v18 = vadd.f32 %v1773_v44, %v1771_v53 }
 0x2d9   : > { %1269 = vadd.xlane.f32.xlu2 %v1268_v18 }
 0x2dc   : > { %v1775_v62 = vpop.eup %1774  ;;  %v1228_v31 = vpop.xlane.xlu0 %1227 }
 0x2dd   : > { %v1272_v32 = vmul.f32 0.6931472, %v1775_v62  ;;  %1776 = vlog2.f32 %v1228_v31 }
 0x2df   : > { %v1303_v24 = vsub.f32 %v2479_v22, %v1272_v32  ;;  %v1304_v36 = vsub.f32 %v2482_v23, %v1272_v32 }
 0x2e1   : > { %1335 = vst [vmem:[%s2613_s7] sm:$0xff] %v1303_v24 }
 0x2e2   : > { %1336 = vst [vmem:[%s2613_s7 + $0x8] sm:$0xff] %v1304_v36 }
 0x2e3   : > { %v1777_v25 = vpop.eup %1776 }
 0x2e4   : > { %v1274_v49 = vmul.f32 0.6931472, %v1777_v25  ;;  %v1231_v33 = vpop.xlane.xlu1 %1230 }
 0x2e5   : > { %1778 = vlog2.f32 %v1231_v33 }
 0x2e6   : > { %v1305_v42 = vsub.f32 %v2489_v54, %v1274_v49  ;;  %v1306_v22 = vsub.f32 %v2492_v52, %v1274_v49 }
 0x2e8   : > { %1337 = vst [vmem:[%s2613_s7 + $0x10] sm:$0xff] %v1305_v42 }
 0x2e9   : > { %1338 = vst [vmem:[%s2613_s7 + $0x18] sm:$0xff] %v1306_v22 }
 0x2eb   : > { %v1779_v23 = vpop.eup %1778 }
 0x2ec   : > { %v1276_v45 = vmul.f32 0.6931472, %v1779_v23  ;;  %v1234_v46 = vpop.xlane.xlu2 %1233 }
 0x2ed   : > { %1780 = vlog2.f32 %v1234_v46 }
 0x2ee   : > { %v1307_v16 = vsub.f32 %v2497_v37, %v1276_v45  ;;  %v1308_v56 = vsub.f32 %v2500_v59, %v1276_v45 }
 0x2f0   : > { %1339 = vst [vmem:[%s2613_s7 + $0x20] sm:$0xff] %v1307_v16 }
 0x2f1   : > { %1340 = vst [vmem:[%s2613_s7 + $0x28] sm:$0xff] %v1308_v56 }
 0x2f3   : > { %v1781_v51 = vpop.eup %1780 }
 0x2f4   : > { %v1278_v54 = vmul.f32 0.6931472, %v1781_v51  ;;  %v1237_v47 = vpop.xlane.xlu0 %1236 }
 0x2f5   : > { %1782 = vlog2.f32 %v1237_v47 }
 0x2f6   : > { %v1309_v52 = vsub.f32 %v2505_v41, %v1278_v54  ;;  %v1310_v63 = vsub.f32 %v2508_v1, %v1278_v54 }
 0x2f8   : > { %1341 = vst [vmem:[%s2613_s7 + $0x30] sm:$0xff] %v1309_v52 }
 0x2f9   : > { %1342 = vst [vmem:[%s2613_s7 + $0x38] sm:$0xff] %v1310_v63 }
 0x2fb   : > { %v1783_v58 = vpop.eup %1782 }
 0x2fc   : > { %v1280_v37 = vmul.f32 0.6931472, %v1783_v58  ;;  %v1240_v35 = vpop.xlane.xlu1 %1239 }
 0x2fd   : > { %1784 = vlog2.f32 %v1240_v35 }
 0x2fe   : > { %v1311_v59 = vsub.f32 %v2513_v4, %v1280_v37  ;;  %v1312_v61 = vsub.f32 %v2516_v9, %v1280_v37 }
 0x300   : > { %1343 = vst [vmem:[%s2613_s7 + $0x40] sm:$0xff] %v1311_v59 }
 0x301   : > { %1344 = vst [vmem:[%s2613_s7 + $0x48] sm:$0xff] %v1312_v61 }
 0x303   : > { %v1785_v3 = vpop.eup %1784 }
 0x304   : > { %v1282_v41 = vmul.f32 0.6931472, %v1785_v3  ;;  %v1243_v5 = vpop.xlane.xlu2 %1242 }
 0x305   : > { %1786 = vlog2.f32 %v1243_v5 }
 0x306   : > { %v1313_v1 = vsub.f32 %v2521_v17, %v1282_v41  ;;  %v1314_v12 = vsub.f32 %v2524_v14, %v1282_v41 }
 0x308   : > { %1345 = vst [vmem:[%s2613_s7 + $0x50] sm:$0xff] %v1313_v1 }
 0x309   : > { %1346 = vst [vmem:[%s2613_s7 + $0x58] sm:$0xff] %v1314_v12 }
 0x30b   : > { %v1787_v13 = vpop.eup %1786 }
 0x30c   : > { %v1284_v4 = vmul.f32 0.6931472, %v1787_v13  ;;  %v1246_v11 = vpop.xlane.xlu0 %1245 }
 0x30d   : > { %1788 = vlog2.f32 %v1246_v11 }
 0x30e   : > { %v1315_v9 = vsub.f32 %v2529_v57, %v1284_v4  ;;  %v1316_v39 = vsub.f32 %v2532_v19, %v1284_v4 }
 0x310   : > { %1347 = vst [vmem:[%s2613_s7 + $0x60] sm:$0xff] %v1315_v9 }
 0x311   : > { %1348 = vst [vmem:[%s2613_s7 + $0x68] sm:$0xff] %v1316_v39 }
 0x313   : > { %v1789_v26 = vpop.eup %1788 }
 0x314   : > { %v1286_v17 = vmul.f32 0.6931472, %v1789_v26  ;;  %v1249_v27 = vpop.xlane.xlu1 %1248 }
 0x315   : > { %1790 = vlog2.f32 %v1249_v27 }
 0x316   : > { %v1317_v14 = vsub.f32 %v2537_v40, %v1286_v17  ;;  %v1318_v28 = vsub.f32 %v2540_v8, %v1286_v17 }
 0x318   : > { %1349 = vst [vmem:[%s2613_s7 + $0x70] sm:$0xff] %v1317_v14 }
 0x319   : > { %1350 = vst [vmem:[%s2613_s7 + $0x78] sm:$0xff] %v1318_v28 }
 0x31b   : > { %v1791_v53 = vpop.eup %1790 }
 0x31c   : > { %v1288_v57 = vmul.f32 0.6931472, %v1791_v53  ;;  %v1252_v20 = vpop.xlane.xlu2 %1251 }
 0x31d   : > { %1792 = vlog2.f32 %v1252_v20 }
 0x31e   : > { %v1319_v19 = vsub.f32 %v2545_v50, %v1288_v57  ;;  %v1320_v44 = vsub.f32 %v2548_v29, %v1288_v57 }
 0x320   : > { %1351 = vst [vmem:[%s2613_s7 + $0x80] sm:$0xff] %v1319_v19 }
 0x321   : > { %1352 = vst [vmem:[%s2613_s7 + $0x88] sm:$0xff] %v1320_v44 }
 0x323   : > { %v1793_v18 = vpop.eup %1792 }
 0x324   : > { %v1290_v40 = vmul.f32 0.6931472, %v1793_v18  ;;  %v1255_v62 = vpop.xlane.xlu0 %1254 }
 0x325   : > { %1794 = vlog2.f32 %v1255_v62 }
 0x326   : > { %v1321_v8 = vsub.f32 %v2553_v0, %v1290_v40  ;;  %v1322_v31 = vsub.f32 %v2556_v34, %v1290_v40 }
 0x328   : > { %1353 = vst [vmem:[%s2613_s7 + $0x90] sm:$0xff] %v1321_v8 }
 0x329   : > { %1354 = vst [vmem:[%s2613_s7 + $0x98] sm:$0xff] %v1322_v31 }
 0x32b   : > { %v1795_v32 = vpop.eup %1794 }
 0x32c   : > { %v1292_v50 = vmul.f32 0.6931472, %v1795_v32  ;;  %v1258_v24 = vpop.xlane.xlu1 %1257 }
 0x32d   : > { %1796 = vlog2.f32 %v1258_v24 }
 0x32e   : > { %v1323_v29 = vsub.f32 %v2561_v21, %v1292_v50  ;;  %v1324_v36 = vsub.f32 %v2564_v38, %v1292_v50 }
 0x330   : > { %1355 = vst [vmem:[%s2613_s7 + $0xa0] sm:$0xff] %v1323_v29 }
 0x331   : > { %1356 = vst [vmem:[%s2613_s7 + $0xa8] sm:$0xff] %v1324_v36 }
 0x333   : > { %v1797_v25 = vpop.eup %1796 }
 0x334   : > { %v1294_v0 = vmul.f32 0.6931472, %v1797_v25  ;;  %v1261_v49 = vpop.xlane.xlu2 %1260 }
 0x335   : > { %1798 = vlog2.f32 %v1261_v49 }
 0x336   : > { %v1325_v34 = vsub.f32 %v2569_v30, %v1294_v0  ;;  %v1326_v33 = vsub.f32 %v2572_v43, %v1294_v0 }
 0x338   : > { %1357 = vst [vmem:[%s2613_s7 + $0xb0] sm:$0xff] %v1325_v34 }
 0x339   : > { %1358 = vst [vmem:[%s2613_s7 + $0xb8] sm:$0xff] %v1326_v33 }
 0x33b   : > { %v1799_v42 = vpop.eup %1798 }
 0x33c   : > { %v1296_v21 = vmul.f32 0.6931472, %v1799_v42  ;;  %v1264_v22 = vpop.xlane.xlu0 %1263 }
 0x33d   : > { %1800 = vlog2.f32 %v1264_v22 }
 0x33e   : > { %v1327_v38 = vsub.f32 %v2577_v6, %v1296_v21  ;;  %v1328_v23 = vsub.f32 %v2580_v48, %v1296_v21 }
 0x340   : > { %1359 = vst [vmem:[%s2613_s7 + $0xc0] sm:$0xff] %v1327_v38 }
 0x341   : > { %1360 = vst [vmem:[%s2613_s7 + $0xc8] sm:$0xff] %v1328_v23 }
 0x343   : > { %v1801_v45 = vpop.eup %1800 }
 0x344   : > { %v1298_v30 = vmul.f32 0.6931472, %v1801_v45  ;;  %v1267_v43 = vpop.xlane.xlu1 %1266 }
 0x345   : > { %1802 = vlog2.f32 %v1267_v43 }
 0x346   : > { %v1329_v46 = vsub.f32 %v2585_v2, %v1298_v30  ;;  %v1330_v16 = vsub.f32 %v2588_v55, %v1298_v30 }
 0x348   : > { %1361 = vst [vmem:[%s2613_s7 + $0xd0] sm:$0xff] %v1329_v46 }
 0x349   : > { %1362 = vst [vmem:[%s2613_s7 + $0xd8] sm:$0xff] %v1330_v16 }
 0x34b   : > { %v1803_v56 = vpop.eup %1802 }
 0x34c   : > { %v1300_v6 = vmul.f32 0.6931472, %v1803_v56  ;;  %v1270_v51 = vpop.xlane.xlu2 %1269 }
 0x34d   : > { %1804 = vlog2.f32 %v1270_v51 }
 0x34e   : > { %v1331_v48 = vsub.f32 %v2593_v10, %v1300_v6  ;;  %v1332_v54 = vsub.f32 %v2596_v60, %v1300_v6 }
 0x350   : > { %1363 = vst [vmem:[%s2613_s7 + $0xe0] sm:$0xff] %v1331_v48 }
 0x351   : > { %1364 = vst [vmem:[%s2613_s7 + $0xe8] sm:$0xff] %v1332_v54 }
 0x353   : > { %v1805_v2 = vpop.eup %1804 }
 0x354   : > { %v1302_v55 = vmul.f32 0.6931472, %v1805_v2 }
 0x356   : > { %v1333_v47 = vsub.f32 %v2601_v15, %v1302_v55  ;;  %v1334_v52 = vsub.f32 %v2604_v7, %v1302_v55 }
 0x358   : > { %1365 = vst [vmem:[%s2613_s7 + $0xf0] sm:$0xff] %v1333_v47 }
 0x359   : > { %1366 = vst [vmem:[%s2613_s7 + $0xf8] sm:$0xff] %v1334_v52 }
 0x35a   : > { %1863 = shalt.err (!%p1860_p8)
}
 0x35b   : > { %s1910_s30 = smov 256   ;;  %s1911_s6 = smov 16  }
 0x35c   : > { %1639 = dma.vmem_to_hbm [thread:$0]  (%p1980_p5), %s1382_s12, 4096, %s1384_s13, %s1368_s22, %s1910_s30, %s1910_s30, %s1911_s6  }
 0x35d PF: > { %p1651_p9 = scmp.ge.s32.totalorder %s1902_s21, 2  ;;  %s1398_s7 = sand.u32 1, %s1890_s18  }
 0x35e   : > { %s1399_s8 = scalar_lea.sflag [#allocation4], %s1398_s7 }
 0x35f   : > { %p1646_p10 = pnand %p1651_p9, %p1984_p6 }
 0x361   : > { %p1647_p11 = pneg %p1646_p10 }
 0x363   : > { %1885 = dma.done.wait (%p1647_p11), %s1399_s8, 4096  }
 0x364   : > { %1887 = vsyncadd (%p1647_p11), %s1399_s8, 4294963200  ;;  %p16_p12 = scmp.ge.s32.totalorder %s1967_s24, 4   ;;  %s2719_s18 = smov %s1894_s19 }
 0x365   : > { %s2720_s19 = smov %s1898_s20  ;;  %s2721_s20 = smov %s1978_s27 }
 0x366   : > { %s2722_s21 = smov %s1967_s24  ;;  %18 = sbr.rel (!%p16_p12) target bundleno = 4 (0x4), region = 81 }
 0x36b   :  { %1405 = vsyncpa [#allocation3], 1 }
 0x36c   :  { %1407 = vsyncpa [#allocation3 + $0x1], 1 }
 0x36d   :  { %1408 = vsyncpa [#allocation4], 1 }
 0x36e   :  { %1410 = vsyncpa [#allocation4 + $0x1], 1 }

</bundles_post_ra>
